<compile_context>
chip_gen: v7x
topology: tpu7x:2x2x1
jax: 0.10.0
libtpu: 0.0.40
codegen_flags: <defaults>
</compile_context>

<pallas_src>
import numpy as np
import jax
import jax.numpy as jnp
from jax.experimental import pallas as pl
from jax.experimental.pallas import tpu as pltpu


def _round_up(x, m):
    return ((x + m - 1) // m) * m


def _pick_tile(n_pad, candidates=(512, 256, 128), prefer_multi=False):
    """Largest candidate tile dividing n_pad; optionally keep >=2 tiles (v7x)."""
    divisors = [t for t in candidates if n_pad % t == 0]
    if not divisors:
        return n_pad
    t = divisors[0]
    if prefer_multi and n_pad // t < 2:
        for c in divisors:
            if n_pad // c >= 2:
                return c
    return t


# ---------------------------------------------------------------------------
# Kernels
# ---------------------------------------------------------------------------

def _fused_kernel(scale_ref, norm_ref, xw_ref, b1_ref, w2_ref, b2_ref, out_ref):
    """Whole forward with norm fully VMEM-resident (small/medium graphs).

    OUT = (norm @ (relu(norm @ XW + b1) @ W2) + b2) * scale
    norm is read from HBM once; HW stays on-chip in f32 (no bf16 round trip).
    """
    h = jnp.dot(norm_ref[...], xw_ref[...], preferred_element_type=jnp.float32)
    h = jnp.maximum(h + b1_ref[...], 0.0)
    # TODO(synk): training-mode stochastic dropout (pltpu.prng_*) not wired in;
    #             eval-mode identity is used, matching `inferir()`.
    hw = jnp.dot(h.astype(w2_ref.dtype), w2_ref[...],
                 preferred_element_type=jnp.float32)
    out = jnp.dot(norm_ref[...], hw.astype(norm_ref.dtype),
                  preferred_element_type=jnp.float32)
    out_ref[...] = (out + b2_ref[...]) * scale_ref[0, 0]


def _gcn_layer1_kernel(norm_ref, xw_ref, b1_ref, w2_ref, hw_ref, acc_ref):
    """Row-tile of: HW = relu(norm @ XW + b1) @ W2 (reduction over norm cols).

    XW is VMEM-resident (constant-index full-array block); the kernel slices
    the (tk, h_pad) rows it needs per reduction step.
    """
    k = pl.program_id(1)
    tk = norm_ref.shape[1]

    @pl.when(k == 0)
    def _():
        acc_ref[...] = jnp.zeros_like(acc_ref)

    off = pl.multiple_of(k * tk, tk)
    acc_ref[...] += jnp.dot(norm_ref[...], xw_ref[pl.ds(off, tk), :],
                            preferred_element_type=jnp.float32)

    @pl.when(k == pl.num_programs(1) - 1)
    def _():
        # f32 epilogue (bias + relu); cast to bf16 only for the MXU projection.
        h = jnp.maximum(acc_ref[...] + b1_ref[...], 0.0)
        # TODO(synk): eval-mode dropout (identity).
        hw_ref[...] = jnp.dot(h.astype(w2_ref.dtype), w2_ref[...],
                              preferred_element_type=jnp.float32
                              ).astype(hw_ref.dtype)


def _gcn_layer2_kernel(scale_ref, norm_ref, hw_ref, b2_ref, out_ref, acc_ref):
    """Row-tile of: OUT = (norm @ HW + b2) * scale (reduction over norm cols).

    HW is VMEM-resident (constant-index full-array block).
    """
    k = pl.program_id(1)
    tk = norm_ref.shape[1]

    @pl.when(k == 0)
    def _():
        acc_ref[...] = jnp.zeros_like(acc_ref)

    off = pl.multiple_of(k * tk, tk)
    acc_ref[...] += jnp.dot(norm_ref[...], hw_ref[pl.ds(off, tk), :],
                            preferred_element_type=jnp.float32)

    @pl.when(k == pl.num_programs(1) - 1)
    def _():
        out_ref[...] = (acc_ref[...] + b2_ref[...]) * scale_ref[0, 0]


# ---------------------------------------------------------------------------
# Host-side graph preprocessing (vectorized, cacheable across forward calls)
# ---------------------------------------------------------------------------

def _gcn_norm_matrix(edge_index, edge_weight, num_nodes):
    """Dense normalized propagation matrix D^{-1/2} (A_prop + I) D^{-1/2}."""
    src = np.asarray(edge_index[0], dtype=np.int64)
    dst = np.asarray(edge_index[1], dtype=np.int64)
    w = np.asarray(edge_weight, dtype=np.float32)
    a = np.zeros((num_nodes, num_nodes), dtype=np.float32)
    np.add.at(a, (dst, src), w)                      # A_prop[dst, src] = w
    a_hat = a + np.eye(num_nodes, dtype=np.float32)
    deg = a_hat.sum(axis=1)
    d_inv_sqrt = 1.0 / np.sqrt(np.maximum(deg, 1e-12))
    return (d_inv_sqrt[:, None] * a_hat) * d_inv_sqrt[None, :]


def _fiedler_scale(edge_index, edge_weight, num_nodes):
    """1 / (second-smallest real eigenvalue of L + 1e-6)."""
    src = np.asarray(edge_index[0], dtype=np.int64)
    dst = np.asarray(edge_index[1], dtype=np.int64)
    w = np.asarray(edge_weight, dtype=np.float32)
    adj = np.zeros((num_nodes, num_nodes), dtype=np.float32)
    np.add.at(adj, (src, dst), w)                    # to_dense_adj: adj[src, dst] = w
    laplacian = np.diag(adj.sum(axis=1)) - adj
    # TODO(synk): torch.linalg.eigvals (dense eigensolver) has no Pallas/TPU
    #             lowering; computed on host with numpy, mirroring the original.
    if np.allclose(laplacian, laplacian.T, rtol=1e-5, atol=1e-6):
        fiedler = np.linalg.eigvalsh(laplacian)[1]   # symmetric: exact & sorted
    else:
        fiedler = np.sort(np.linalg.eigvals(laplacian).real)[1]
    return np.float32(1.0 / (fiedler + 1e-6))


def precompute_graph(edge_index, edge_weight, num_nodes):
    """Build (norm, scale) once; pass as graph_cache to amortize over calls."""
    return (_gcn_norm_matrix(edge_index, edge_weight, num_nodes),
            _fiedler_scale(edge_index, edge_weight, num_nodes))


# ---------------------------------------------------------------------------
# Forward
# ---------------------------------------------------------------------------

def rede_neural_hibrida_forward(x, edge_index, edge_weight, params,
                                *, graph_cache=None, max_fused_nodes=2048):
    """x: [N, num_features] f32; edge_index: [2, E] int; edge_weight: [E] f32.

    If the padded node count fits `max_fused_nodes`, the whole forward runs in
    a single fused pallas_call with `norm` resident in VMEM (norm read once).
    Otherwise a two-pass tiled path is used with VMEM-resident XW / HW.
    """
    x = jnp.asarray(x, jnp.float32)
    n, f = x.shape
    hidden = params["w1"].shape[1]
    num_classes = params["w2"].shape[1]

    if edge_weight is None:
        edge_weight = np.ones((np.asarray(edge_index).shape[1],), np.float32)

    if graph_cache is None:
        graph_cache = precompute_graph(np.asarray(edge_index),
                                       np.asarray(edge_weight), n)
    norm_np, scale_np = graph_cache

    # ---- pad to lane-dense / tile-aligned shapes (flat 128 granularity;
    #      512 only for very large N so big tiles stay available) ----
    pad_gran = 512 if n >= 4096 else 128
    n_pad = _round_up(n, pad_gran)
    h_pad = _round_up(hidden, 128)
    c_pad = _round_up(num_classes, 128)

    # Host-side pad + cast to bf16 before transfer (no n_pad^2 f32 transient).
    norm_host = np.zeros((n_pad, n_pad), dtype=jnp.bfloat16)
    norm_host[:n, :n] = norm_np.astype(jnp.bfloat16)
    norm = jnp.asarray(norm_host)                          # dominant HBM traffic

    w1 = jnp.asarray(params["w1"], jnp.float32)
    b1 = jnp.asarray(params["b1"], jnp.float32).reshape(1, -1)
    w2 = jnp.asarray(params["w2"], jnp.float32)
    b2 = jnp.asarray(params["b2"], jnp.float32).reshape(1, -1)

    w1_pad = jnp.zeros((f, h_pad), jnp.float32).at[:, :hidden].set(w1)
    b1_pad = jnp.zeros((1, h_pad), jnp.float32).at[:, :hidden].set(b1)
    w2_pad = jnp.zeros((h_pad, c_pad), jnp.float32).at[:hidden, :num_classes].set(w2)
    b2_pad = jnp.zeros((1, c_pad), jnp.float32).at[:, :num_classes].set(b2)
    w2_bf16 = w2_pad.astype(jnp.bfloat16)

    # Hoist the tiny feature matmul X @ W1 out of the per-tile path
    # (O(N*F*H) vs the O(N^2*H) propagation matmul inside the kernel).
    xw = jnp.dot(x, w1_pad, preferred_element_type=jnp.float32)        # [n, h_pad]
    xw_pad = jnp.zeros((n_pad, h_pad), jnp.bfloat16).at[:n].set(
        xw.astype(jnp.bfloat16))

    scale = jnp.asarray(scale_np, jnp.float32).reshape(1, 1)

    # <= ~48 MiB keeps us under v7x's 64 MiB physical VMEM; fine on v5e/v6e.
    vmem_limit = 48 * 1024 * 1024

    # ---------------- fused path: norm resident, read from HBM once ----------
    if n_pad <= max_fused_nodes:
        out_pad = pl.pallas_call(
            _fused_kernel,
            out_shape=jax.ShapeDtypeStruct((n_pad, c_pad), jnp.float32),
            grid=(1,),
            in_specs=[
                pl.BlockSpec(memory_space=pltpu.MemorySpace.SMEM),   # scale (1,1)
                pl.BlockSpec((n_pad, n_pad), lambda i: (0, 0)),      # norm (resident)
                pl.BlockSpec((n_pad, h_pad), lambda i: (0, 0)),      # XW
                pl.BlockSpec((1, h_pad), lambda i: (0, 0)),          # b1
                pl.BlockSpec((h_pad, c_pad), lambda i: (0, 0)),      # W2
                pl.BlockSpec((1, c_pad), lambda i: (0, 0)),          # b2
            ],
            out_specs=pl.BlockSpec((n_pad, c_pad), lambda i: (0, 0)),
            compiler_params=pltpu.CompilerParams(
                dimension_semantics=("arbitrary",),
                vmem_limit_bytes=vmem_limit),
        )(scale, norm, xw_pad, b1_pad, w2_bf16, b2_pad)
        return out_pad[:n, :num_classes]

    # ---------------- tiled two-pass path (large graphs) ---------------------
    tk = _pick_tile(n_pad)                                  # reduction tile
    tm = _pick_tile(n_pad, prefer_multi=True)               # >=2 row tiles (v7x)
    grid = (n_pad // tm, n_pad // tk)
    cparams = pltpu.CompilerParams(
        dimension_semantics=("parallel", "arbitrary"),       # rows across TCs
        vmem_limit_bytes=vmem_limit)

    # layer 1: HW = relu(norm @ XW + b1) @ W2
    hw = pl.pallas_call(
        _gcn_layer1_kernel,
        out_shape=jax.ShapeDtypeStruct((n_pad, c_pad), jnp.bfloat16),
        grid=grid,
        in_specs=[
            pl.BlockSpec((tm, tk), lambda i, k: (i, k)),             # norm tile
            pl.BlockSpec((n_pad, h_pad), lambda i, k: (0, 0)),       # XW resident
            pl.BlockSpec((1, h_pad), lambda i, k: (0, 0)),           # b1
            pl.BlockSpec((h_pad, c_pad), lambda i, k: (0, 0)),       # W2
        ],
        out_specs=pl.BlockSpec((tm, c_pad), lambda i, k: (i, 0)),
        scratch_shapes=[pltpu.VMEM((tm, h_pad), jnp.float32)],
        compiler_params=cparams,
    )(norm, xw_pad, b1_pad, w2_bf16)

    # Padded rows of HW would otherwise hold relu(b1) @ W2; zero them so
    # correctness does not hinge on norm's zero padded columns.
    if n_pad > n:
        hw = hw.at[n:, :].set(jnp.zeros((), hw.dtype))

    # layer 2: OUT = (norm @ HW + b2) * 1/(fiedler + 1e-6)
    out_pad = pl.pallas_call(
        _gcn_layer2_kernel,
        out_shape=jax.ShapeDtypeStruct((n_pad, c_pad), jnp.float32),
        grid=grid,
        in_specs=[
            pl.BlockSpec(memory_space=pltpu.MemorySpace.SMEM),       # scale (1,1)
            pl.BlockSpec((tm, tk), lambda i, k: (i, k)),             # norm tile
            pl.BlockSpec((n_pad, c_pad), lambda i, k: (0, 0)),       # HW resident
            pl.BlockSpec((1, c_pad), lambda i, k: (0, 0)),           # b2
        ],
        out_specs=pl.BlockSpec((tm, c_pad), lambda i, k: (i, 0)),
        scratch_shapes=[pltpu.VMEM((tm, c_pad), jnp.float32)],
        compiler_params=cparams,
    )(scale, norm, hw, b2_pad)

    return out_pad[:n, :num_classes]


def init_params(key, num_features, hidden_dim, num_classes):
    k1, k2 = jax.random.split(key)
    return {
        "w1": (0.1 * jax.random.normal(k1, (num_features, hidden_dim))).astype(jnp.float32),
        "b1": jnp.zeros((hidden_dim,), jnp.float32),
        "w2": (0.1 * jax.random.normal(k2, (hidden_dim, num_classes))).astype(jnp.float32),
        "b2": jnp.zeros((num_classes,), jnp.float32),
    }


if __name__ == "__main__":
    NUM_NODES = 512
    NUM_FEATURES = 16
    HIDDEN_DIM = 32
    NUM_CLASSES = 8

    key = jax.random.PRNGKey(0)
    k_x, k_w1, k_w2, k_p = jax.random.split(key, 4)

    # Node features [N, num_features]
    x = jax.random.normal(k_x, (NUM_NODES, NUM_FEATURES), dtype=jnp.float32)

    # Undirected graph (ring + a few chords), symmetric positive weights.
    ring_w = np.asarray(jax.random.uniform(k_w1, (NUM_NODES,), minval=0.5, maxval=1.5))
    chord_w = np.asarray(jax.random.uniform(k_w2, (NUM_NODES // 8,), minval=0.5, maxval=1.5))
    src, dst, w = [], [], []
    for i in range(NUM_NODES):
        j = (i + 1) % NUM_NODES
        src += [i, j]; dst += [j, i]; w += [float(ring_w[i])] * 2
    for c, i in enumerate(range(0, NUM_NODES, 8)):
        j = (i + NUM_NODES // 2) % NUM_NODES
        src += [i, j]; dst += [j, i]; w += [float(chord_w[c])] * 2
    edge_index = np.array([src, dst], dtype=np.int64)     # [2, E]
    edge_weight = np.array(w, dtype=np.float32)           # [E]

    params = init_params(k_p, NUM_FEATURES, HIDDEN_DIM, NUM_CLASSES)

    # Host preprocessing done once and reused (cacheable across calls).
    graph_cache = precompute_graph(edge_index, edge_weight, NUM_NODES)

    # Fused path (norm resident, default for small graphs).
    emb_fused = rede_neural_hibrida_forward(
        x, edge_index, edge_weight, params, graph_cache=graph_cache)
    # Tiled two-pass path (forced, exercises the large-graph code path).
    emb_tiled = rede_neural_hibrida_forward(
        x, edge_index, edge_weight, params, graph_cache=graph_cache,
        max_fused_nodes=0)
    jax.block_until_ready((emb_fused, emb_tiled))

    # Pure-JAX f32 reference of the same dense-GCN forward for a sanity check.
    norm_ref = jnp.asarray(graph_cache[0])
    h_ref = jnp.maximum(norm_ref @ (x @ params["w1"]) + params["b1"], 0.0)
    ref = (norm_ref @ (h_ref @ params["w2"]) + params["b2"]) * graph_cache[1]

    for emb in (emb_fused, emb_tiled):
        assert emb.shape == (NUM_NODES, NUM_CLASSES)
        assert bool(jnp.all(jnp.isfinite(emb)))
        rel_err = float(jnp.max(jnp.abs(emb - ref)) /
                        (jnp.max(jnp.abs(ref)) + 1e-6))
        assert rel_err < 5e-2, f"relative error too large: {rel_err}"
    print("KERNEL_OK")
</pallas_src>

<mosaic_0001>
module attributes {stable_mosaic.version = 11 : i64} {
  func.func @_fused_kernel(%arg0: i32, %arg1: memref<1x1xf32, #tpu.memory_space<smem>>, %arg2: memref<512x512xbf16, #tpu.memory_space<vmem>>, %arg3: memref<512x128xbf16, #tpu.memory_space<vmem>>, %arg4: memref<1x128xf32, #tpu.memory_space<vmem>>, %arg5: memref<128x128xbf16, #tpu.memory_space<vmem>>, %arg6: memref<1x128xf32, #tpu.memory_space<vmem>>, %arg7: memref<512x128xf32, #tpu.memory_space<vmem>>) attributes {dimension_semantics = [#tpu.dimension_semantics<arbitrary>], iteration_bounds = array<i64: 1>, scalar_prefetch = 0 : i64, scratch_operands = 0 : i64, tpu.core_type = #tpu.core_type<tc>, window_params = [{transform_indices = @transform_0, window_bounds = array<i64: 1, 1>}, {pipeline_mode = #tpu.pipeline_mode<synchronous>, transform_indices = @transform_1, window_bounds = array<i64: 512, 512>}, {pipeline_mode = #tpu.pipeline_mode<synchronous>, transform_indices = @transform_2, window_bounds = array<i64: 512, 128>}, {pipeline_mode = #tpu.pipeline_mode<synchronous>, transform_indices = @transform_3, window_bounds = array<i64: 1, 128>}, {pipeline_mode = #tpu.pipeline_mode<synchronous>, transform_indices = @transform_4, window_bounds = array<i64: 128, 128>}, {pipeline_mode = #tpu.pipeline_mode<synchronous>, transform_indices = @transform_5, window_bounds = array<i64: 1, 128>}, {pipeline_mode = #tpu.pipeline_mode<synchronous>, transform_indices = @transform_6, window_bounds = array<i64: 512, 128>}]} {
    %c0 = arith.constant 0 : index
    %c0_0 = arith.constant 0 : index
    %0 = vector.load %arg2[%c0, %c0_0] : memref<512x512xbf16, #tpu.memory_space<vmem>>, vector<512x512xbf16>
    %c0_1 = arith.constant 0 : index
    %c0_2 = arith.constant 0 : index
    %1 = vector.load %arg3[%c0_1, %c0_2] : memref<512x128xbf16, #tpu.memory_space<vmem>>, vector<512x128xbf16>
    %cst = arith.constant dense<0.000000e+00> : vector<512x128xf32>
    %2 = tpu.matmul %0, %1, %cst {dimension_numbers = #tpu.dot_dimension_numbers<[1], [0], [0], [1], [0, 0, 1, 1], [], []>} : vector<512x512xbf16>, vector<512x128xbf16>, vector<512x128xf32> -> vector<512x128xf32>
    %c0_3 = arith.constant 0 : index
    %c0_4 = arith.constant 0 : index
    %3 = vector.load %arg4[%c0_3, %c0_4] : memref<1x128xf32, #tpu.memory_space<vmem>>, vector<1x128xf32>
    %4 = vector.broadcast %3 : vector<1x128xf32> to vector<512x128xf32>
    %5 = arith.addf %2, %4 : vector<512x128xf32>
    %cst_5 = arith.constant 0.000000e+00 : f32
    %6 = vector.broadcast %cst_5 : f32 to vector<512x128xf32>
    %7 = arith.maximumf %5, %6 : vector<512x128xf32>
    %8 = arith.truncf %7 : vector<512x128xf32> to vector<512x128xbf16>
    %c0_6 = arith.constant 0 : index
    %c0_7 = arith.constant 0 : index
    %9 = vector.load %arg5[%c0_6, %c0_7] : memref<128x128xbf16, #tpu.memory_space<vmem>>, vector<128x128xbf16>
    %cst_8 = arith.constant dense<0.000000e+00> : vector<512x128xf32>
    %10 = tpu.matmul %8, %9, %cst_8 {dimension_numbers = #tpu.dot_dimension_numbers<[1], [0], [0], [1], [0, 0, 1, 1], [], []>} : vector<512x128xbf16>, vector<128x128xbf16>, vector<512x128xf32> -> vector<512x128xf32>
    %c0_9 = arith.constant 0 : index
    %c0_10 = arith.constant 0 : index
    %11 = vector.load %arg2[%c0_9, %c0_10] : memref<512x512xbf16, #tpu.memory_space<vmem>>, vector<512x512xbf16>
    %12 = arith.truncf %10 : vector<512x128xf32> to vector<512x128xbf16>
    %cst_11 = arith.constant dense<0.000000e+00> : vector<512x128xf32>
    %13 = tpu.matmul %11, %12, %cst_11 {dimension_numbers = #tpu.dot_dimension_numbers<[1], [0], [0], [1], [0, 0, 1, 1], [], []>} : vector<512x512xbf16>, vector<512x128xbf16>, vector<512x128xf32> -> vector<512x128xf32>
    %c0_12 = arith.constant 0 : index
    %c0_13 = arith.constant 0 : index
    %14 = vector.load %arg6[%c0_12, %c0_13] : memref<1x128xf32, #tpu.memory_space<vmem>>, vector<1x128xf32>
    %15 = vector.broadcast %14 : vector<1x128xf32> to vector<512x128xf32>
    %16 = arith.addf %13, %15 : vector<512x128xf32>
    %c0_14 = arith.constant 0 : index
    %c0_15 = arith.constant 0 : index
    %17 = memref.load %arg1[%c0_14, %c0_15] : memref<1x1xf32, #tpu.memory_space<smem>>
    %18 = vector.broadcast %17 : f32 to vector<512x128xf32>
    %19 = arith.mulf %16, %18 : vector<512x128xf32>
    %c0_16 = arith.constant 0 : index
    %c0_17 = arith.constant 0 : index
    %20 = vector.load %arg7[%c0_16, %c0_17] : memref<512x128xf32, #tpu.memory_space<vmem>>, vector<512x128xf32>
    tpu.vector_store %arg7[%c0_16, %c0_17], %19 {strides = array<i32>} : memref<512x128xf32, #tpu.memory_space<vmem>>, vector<512x128xf32>,
    return
  }
  func.func @transform_0(%arg0: i32) -> (i32, i32) {
    %c0_i32 = arith.constant 0 : i32
    %c0_i32_0 = arith.constant 0 : i32
    %c0_i32_1 = arith.constant 0 : i32
    return %c0_i32, %c0_i32_0 : i32, i32
  }
  func.func @transform_1(%arg0: i32) -> (i32, i32) {
    %c0_i32 = arith.constant 0 : i32
    %c0_i32_0 = arith.constant 0 : i32
    %c0_i32_1 = arith.constant 0 : i32
    return %c0_i32, %c0_i32_0 : i32, i32
  }
  func.func @transform_2(%arg0: i32) -> (i32, i32) {
    %c0_i32 = arith.constant 0 : i32
    %c0_i32_0 = arith.constant 0 : i32
    %c0_i32_1 = arith.constant 0 : i32
    return %c0_i32, %c0_i32_0 : i32, i32
  }
  func.func @transform_3(%arg0: i32) -> (i32, i32) {
    %c0_i32 = arith.constant 0 : i32
    %c0_i32_0 = arith.constant 0 : i32
    %c0_i32_1 = arith.constant 0 : i32
    return %c0_i32, %c0_i32_0 : i32, i32
  }
  func.func @transform_4(%arg0: i32) -> (i32, i32) {
    %c0_i32 = arith.constant 0 : i32
    %c0_i32_0 = arith.constant 0 : i32
    %c0_i32_1 = arith.constant 0 : i32
    return %c0_i32, %c0_i32_0 : i32, i32
  }
  func.func @transform_5(%arg0: i32) -> (i32, i32) {
    %c0_i32 = arith.constant 0 : i32
    %c0_i32_0 = arith.constant 0 : i32
    %c0_i32_1 = arith.constant 0 : i32
    return %c0_i32, %c0_i32_0 : i32, i32
  }
  func.func @transform_6(%arg0: i32) -> (i32, i32) {
    %c0_i32 = arith.constant 0 : i32
    %c0_i32_0 = arith.constant 0 : i32
    %c0_i32_1 = arith.constant 0 : i32
    return %c0_i32, %c0_i32_0 : i32, i32
  }
}

</mosaic_0001>

<bundles_post_ra>
// kernel: tpu_custom_call.1
= control target key start
LH: loop header
LB: loop body
LE: loop exit
PB: predicated region body
PF: predicated region fallthrough
CT: control target
= control target key end

     0   :  { %12 = vsyncpa [#allocation4], 0  ;;  %s4416_s0 = inlined_call_operand.<no memory space> [shape: f32[1,1], index: 0, kind: input, shape index: {}]   ;;  %s4417_s1 = inlined_call_operand.hbm [shape: bf16[512,512], index: 1, kind: input, shape index: {}]   ;;  %s4418_s2 = inlined_call_operand.hbm [shape: bf16[512,128], index: 2, kind: input, shape index: {}]   ;;  %s4419_s3 = inlined_call_operand.vmem [shape: f32[1,128], index: 3, kind: input, shape index: {}]   ;;  %s4420_s4 = inlined_call_operand.hbm [shape: bf16[128,128], index: 4, kind: input, shape index: {}]   ;;  %s4421_s5 = inlined_call_operand.vmem [shape: f32[1,128], index: 5, kind: input, shape index: {}]   ;;  %s4422_s6 = inlined_call_operand.hbm [shape: f32[512,128], index: 6, kind: output, shape index: {}]  }
   0x1   :  { %13 = vsyncpa [#allocation7], 0 }
   0x2   :  { %14 = vsyncpa [#allocation5], 0  ;;  %s4045_s21 = smov [#allocation6]   ;;  %s3951_s25 = scalar_lea.hbm %s4418_s2, 4096 }
   0x3   :  { %s34_s22 = sshll.u32 %s4045_s21, 4  ;;  %p3952_p0 = scmp.ne.s32.totalorder %s4418_s2, %s3951_s25  ;;  %s35_s22 = int_to_ptr.vmem [resolvable:$true] %s34_s22 }
   0x4   :  { %p3955_p1 = scmp.lt.u32.totalorder %s3951_s25, %s4418_s2 }
   0x6   :  { %p3957_p2 = pnand %p3955_p1, %p3952_p0 }
   0x8   :  { %3960 = shalt.err (!%p3957_p2)
}
   0x9   :  { %s3961_s30 = scalar_lea.vmem %s35_s22, 4096  ;;  %p3966_p4 = scmp.lt.s32.totalorder %s35_s22, %s35_s22 }
   0xa   :  { %p3962_p3 = scmp.ne.s32.totalorder %s35_s22, %s3961_s30  ;;  %p3967_p5 = scmp.lt.s32.totalorder %s3961_s30, %s3961_s30 }
   0xc   :  { %p3968_p6 = por %p3967_p5, %p3966_p4 }
   0xe   :  { %p3969_p7 = pnand %p3968_p6, %p3962_p3 }
  0x10   :  { %3972 = shalt.err (!%p3969_p7)
}
  0x11   :  { %s4046_s7 = smov 64   ;;  %s4047_s8 = smov 4  }
  0x12   :  { %40 = dma.hbm_to_vmem [thread:$0]  %s4418_s2, 4096, %s35_s22, [#allocation7], %s4046_s7, %s4046_s7, %s4047_s8  }
  0x13   :  { %s4048_s11 = smov [#allocation3]   ;;  %s3973_s15 = scalar_lea.hbm %s4417_s1, 16384 }
  0x14   :  { %s22_s12 = sshll.u32 %s4048_s11, 4  ;;  %p3974_p8 = scmp.ne.s32.totalorder %s4417_s1, %s3973_s15  ;;  %s23_s12 = int_to_ptr.vmem [resolvable:$true] %s22_s12 }
  0x15   :  { %p3977_p9 = scmp.lt.u32.totalorder %s3973_s15, %s4417_s1 }
  0x17   :  { %p3979_p10 = pnand %p3977_p9, %p3974_p8 }
  0x19   :  { %3982 = shalt.err (!%p3979_p10)
}
  0x1a   :  { %s3983_s20 = scalar_lea.vmem %s23_s12, 16384  ;;  %p3988_p12 = scmp.lt.s32.totalorder %s23_s12, %s23_s12 }
  0x1b   :  { %p3984_p11 = scmp.ne.s32.totalorder %s23_s12, %s3983_s20  ;;  %p3989_p13 = scmp.lt.s32.totalorder %s3983_s20, %s3983_s20 }
  0x1d   :  { %p3990_p0 = por %p3989_p13, %p3988_p12 }
  0x1f   :  { %p3991_p1 = pnand %p3990_p0, %p3984_p11 }
  0x21   :  { %3994 = shalt.err (!%p3991_p1)
}
  0x22   :  { %s4049_s2 = smov 256   ;;  %s4050_s21 = smov 16  }
  0x23   :  { %28 = dma.hbm_to_vmem [thread:$0]  %s4417_s1, 16384, %s23_s12, [#allocation4], %s4049_s2, %s4049_s2, %s4050_s21  }
  0x24   :  { %s4051_s24 = smov [#allocation8]   ;;  %s3995_s28 = scalar_lea.hbm %s4420_s4, 1024 }
  0x25   :  { %s48_s25 = sshll.u32 %s4051_s24, 4  ;;  %p3996_p2 = scmp.ne.s32.totalorder %s4420_s4, %s3995_s28  ;;  %s49_s25 = int_to_ptr.vmem [resolvable:$true] %s48_s25 }
  0x26   :  { %p3999_p3 = scmp.lt.u32.totalorder %s3995_s28, %s4420_s4 }
  0x28   :  { %p4001_p4 = pnand %p3999_p3, %p3996_p2 }
  0x2a   :  { %4004 = shalt.err (!%p4001_p4)
}
  0x2b   :  { %s4005_s11 = scalar_lea.vmem %s49_s25, 1024  ;;  %p4010_p6 = scmp.lt.s32.totalorder %s49_s25, %s49_s25 }
  0x2c   :  { %p4006_p5 = scmp.ne.s32.totalorder %s49_s25, %s4005_s11  ;;  %p4011_p7 = scmp.lt.s32.totalorder %s4005_s11, %s4005_s11 }
  0x2e   :  { %p4012_p8 = por %p4011_p7, %p4010_p6 }
  0x30   :  { %p4013_p9 = pnand %p4012_p8, %p4006_p5 }
  0x32   :  { %4016 = shalt.err (!%p4013_p9)
}
  0x33   :  { %54 = dma.hbm_to_vmem [thread:$0]  %s4420_s4, 1024, %s49_s25, [#allocation7], %s4046_s7, %s4046_s7, %s4047_s8  }
  0x34   :  { %4039 = dma.done.wait [#allocation4], 16384  }
  0x35   :  { %4040 = vsyncadd [#allocation4], 4294950912 }
  0x36   :  { %4041 = dma.done.wait [#allocation7], 5120  }
  0x37   :  { %4042 = vsyncadd [#allocation7], 4294962176  ;;  %v4052_v0 = vmov 0   ;;  %v3591_v1 = vld [vmem:[#allocation6] sm:$0xff]   ;;  %v3592_v2 = vld [vmem:[#allocation6 + $0x8] sm:$0xff]  }
  0x38   :  { %1098 = vmatprep.subr.bf16.mxu0 %v4052_v0  ;;  %v3593_v3 = vld [vmem:[#allocation6 + $0x10] sm:$0xff]   ;;  %v3594_v4 = vld [vmem:[#allocation6 + $0x18] sm:$0xff]   ;;  %v3595_v5 = vld [vmem:[#allocation6 + $0x20] sm:$0xff]  }
  0x39   :  { %1099 = vmatpush1.bf16.msra.mxu0 %v3591_v1  ;;  %v3609_v6 = vld [vmem:[#allocation3 + $0x4] ss:$16 sps:$4 sm:$0xff]   ;;  %v3596_v7 = vld [vmem:[#allocation6 + $0x28] sm:$0xff]   ;;  %v3598_v9 = vld [vmem:[#allocation6 + $0x38] sm:$0xff]  }
  0x3a   :  { %1100 = vmatprep.subr.bf16.mxu0 %v4052_v0  ;;  %1130 = vmatprep.mubr.bf16.mxu0 %v3609_v6  ;;  %v3597_v8 = vld [vmem:[#allocation6 + $0x30] sm:$0xff]   ;;  %v3599_v10 = vld [vmem:[#allocation6 + $0x40] sm:$0xff]   ;;  %v3600_v11 = vld [vmem:[#allocation6 + $0x48] sm:$0xff]  }
  0x3b   :  { %v3601_v12 = vld [vmem:[#allocation6 + $0x50] sm:$0xff]   ;;  %v3602_v13 = vld [vmem:[#allocation6 + $0x58] sm:$0xff]   ;;  %v3603_v14 = vld [vmem:[#allocation6 + $0x60] sm:$0xff]  }
  0x3c   :  { %v3604_v15 = vld [vmem:[#allocation6 + $0x68] sm:$0xff]   ;;  %v3605_v16 = vld [vmem:[#allocation6 + $0x70] sm:$0xff]   ;;  %v3606_v17 = vld [vmem:[#allocation6 + $0x78] sm:$0xff]  }
  0x3d   :  { %1101 = vmatpush1.bf16.msra.mxu0 %v3592_v2  ;;  %v3607_v18 = vld [vmem:[#allocation3] ss:$16 sps:$4 sm:$0xff]   ;;  %v3610_v19 = vld [vmem:[#allocation3 + $0x24] ss:$16 sps:$4 sm:$0xff]   ;;  %v3620_v21 = vld [vmem:[#allocation6 + $0x88] sm:$0xff]  }
  0x3e   :  { %1102 = vmatprep.subr.bf16.mxu0 %v4052_v0  ;;  %v3613_v20 = vld [vmem:[#allocation6 + $0x80] sm:$0xff]   ;;  %v3627_v24 = vld [vmem:[#allocation6 + $0x90] sm:$0xff]   ;;  %v3634_v25 = vld [vmem:[#allocation6 + $0x98] sm:$0xff]  }
  0x3f   :  { %v3612_v22 = vld [vmem:[#allocation3 + $0x20] ss:$16 sps:$4 sm:$0xff]   ;;  %v3614_v23 = vld [vmem:[#allocation3 + $0x44] ss:$16 sps:$4 sm:$0xff]   ;;  %v3648_v29 = vld [vmem:[#allocation6 + $0xa8] sm:$0xff]  }
  0x40   :  { %v3616_v26 = vld [vmem:[#allocation3 + $0x40] ss:$16 sps:$4 sm:$0xff]   ;;  %v3617_v27 = vld [vmem:[#allocation3 + $0x64] ss:$16 sps:$4 sm:$0xff]   ;;  %v3662_v33 = vld [vmem:[#allocation6 + $0xb8] sm:$0xff]  }
  0x41   :  { %1103 = vmatpush1.bf16.msra.mxu0 %v3593_v3  ;;  %v3641_v28 = vld [vmem:[#allocation6 + $0xa0] sm:$0xff]   ;;  %v3655_v32 = vld [vmem:[#allocation6 + $0xb0] sm:$0xff]   ;;  %v3676_v37 = vld [vmem:[#allocation6 + $0xc8] sm:$0xff]  }
  0x42   :  { %1104 = vmatprep.subr.bf16.mxu0 %v4052_v0  ;;  %v3619_v30 = vld [vmem:[#allocation3 + $0x60] ss:$16 sps:$4 sm:$0xff]   ;;  %v3621_v31 = vld [vmem:[#allocation3 + $0x84] ss:$16 sps:$4 sm:$0xff]   ;;  %v3690_v45 = vld [vmem:[#allocation6 + $0xd8] sm:$0xff]  }
  0x43   :  { %v3623_v34 = vld [vmem:[#allocation3 + $0x80] ss:$16 sps:$4 sm:$0xff]   ;;  %v3624_v35 = vld [vmem:[#allocation3 + $0xa4] ss:$16 sps:$4 sm:$0xff]   ;;  %v3704_v55 = vld [vmem:[#allocation6 + $0xe8] sm:$0xff]  }
  0x44   :  { %v3669_v36 = vld [vmem:[#allocation6 + $0xc0] sm:$0xff]   ;;  %v3683_v40 = vld [vmem:[#allocation6 + $0xd0] sm:$0xff]   ;;  %v3718_v2 = vld [vmem:[#allocation6 + $0xf8] sm:$0xff]  }
  0x45   :  { %1105 = vmatpush1.bf16.msra.mxu0 %v3594_v4  ;;  %v3626_v38 = vld [vmem:[#allocation3 + $0xa0] ss:$16 sps:$4 sm:$0xff]   ;;  %v3628_v39 = vld [vmem:[#allocation3 + $0xc4] ss:$16 sps:$4 sm:$0xff]  }
  0x46   :  { %1106 = vmatprep.subr.bf16.mxu0 %v4052_v0  ;;  %v3630_v41 = vld [vmem:[#allocation3 + $0xc0] ss:$16 sps:$4 sm:$0xff]   ;;  %v3631_v42 = vld [vmem:[#allocation3 + $0xe4] ss:$16 sps:$4 sm:$0xff]  }
  0x47   :  { %v3633_v43 = vld [vmem:[#allocation3 + $0xe0] ss:$16 sps:$4 sm:$0xff]   ;;  %v3635_v44 = vld [vmem:[#allocation3 + $0x104] ss:$16 sps:$4 sm:$0xff]  }
  0x48   :  { %v3637_v46 = vld [vmem:[#allocation3 + $0x100] ss:$16 sps:$4 sm:$0xff]   ;;  %v3638_v47 = vld [vmem:[#allocation3 + $0x124] ss:$16 sps:$4 sm:$0xff]  }
  0x49   :  { %1107 = vmatpush1.bf16.msra.mxu0 %v3595_v5  ;;  %v3640_v48 = vld [vmem:[#allocation3 + $0x120] ss:$16 sps:$4 sm:$0xff]   ;;  %v3642_v49 = vld [vmem:[#allocation3 + $0x144] ss:$16 sps:$4 sm:$0xff]  }
  0x4a   :  { %1108 = vmatprep.subr.bf16.mxu0 %v4052_v0  ;;  %v3697_v50 = vld [vmem:[#allocation6 + $0xe0] sm:$0xff]   ;;  %v3711_v60 = vld [vmem:[#allocation6 + $0xf0] sm:$0xff]  }
  0x4b   :  { %v3644_v51 = vld [vmem:[#allocation3 + $0x140] ss:$16 sps:$4 sm:$0xff]   ;;  %v3645_v52 = vld [vmem:[#allocation3 + $0x164] ss:$16 sps:$4 sm:$0xff]  }
  0x4c   :  { %v3647_v53 = vld [vmem:[#allocation3 + $0x160] ss:$16 sps:$4 sm:$0xff]   ;;  %v3649_v54 = vld [vmem:[#allocation3 + $0x184] ss:$16 sps:$4 sm:$0xff]  }
  0x4d   :  { %1109 = vmatpush1.bf16.msra.mxu0 %v3596_v7  ;;  %v3651_v56 = vld [vmem:[#allocation3 + $0x180] ss:$16 sps:$4 sm:$0xff]   ;;  %v3652_v57 = vld [vmem:[#allocation3 + $0x1a4] ss:$16 sps:$4 sm:$0xff]  }
  0x4e   :  { %1110 = vmatprep.subr.bf16.mxu0 %v4052_v0  ;;  %v3654_v58 = vld [vmem:[#allocation3 + $0x1a0] ss:$16 sps:$4 sm:$0xff]   ;;  %v3656_v59 = vld [vmem:[#allocation3 + $0x1c4] ss:$16 sps:$4 sm:$0xff]  }
  0x4f   :  { %v3658_v61 = vld [vmem:[#allocation3 + $0x1c0] ss:$16 sps:$4 sm:$0xff]   ;;  %v3659_v62 = vld [vmem:[#allocation3 + $0x1e4] ss:$16 sps:$4 sm:$0xff]  }
  0x50   :  { %v3661_v63 = vld [vmem:[#allocation3 + $0x1e0] ss:$16 sps:$4 sm:$0xff]   ;;  %v3663_v1 = vld [vmem:[#allocation3 + $0x204] ss:$16 sps:$4 sm:$0xff]  }
  0x51   :  { %1111 = vmatpush1.bf16.msra.mxu0 %v3597_v8  ;;  %v3665_v3 = vld [vmem:[#allocation3 + $0x200] ss:$16 sps:$4 sm:$0xff]   ;;  %v3666_v4 = vld [vmem:[#allocation3 + $0x224] ss:$16 sps:$4 sm:$0xff]  }
  0x52   :  { %1112 = vmatprep.subr.bf16.mxu0 %v4052_v0  ;;  %v3668_v5 = vld [vmem:[#allocation3 + $0x220] ss:$16 sps:$4 sm:$0xff]   ;;  %v3670_v6 = vld [vmem:[#allocation3 + $0x244] ss:$16 sps:$4 sm:$0xff]  }
  0x53   :  { %v3672_v7 = vld [vmem:[#allocation3 + $0x240] ss:$16 sps:$4 sm:$0xff]   ;;  %v3673_v8 = vld [vmem:[#allocation3 + $0x264] ss:$16 sps:$4 sm:$0xff]  }
  0x55   :  { %1113 = vmatpush1.bf16.msra.mxu0 %v3598_v9  ;;  %v3675_v9 = vld [vmem:[#allocation3 + $0x260] ss:$16 sps:$4 sm:$0xff]  }
  0x56   :  { %1114 = vmatprep.subr.bf16.mxu0 %v4052_v0 }
  0x59   :  { %1115 = vmatpush1.bf16.msra.mxu0 %v3599_v10  ;;  %v3677_v10 = vld [vmem:[#allocation3 + $0x284] ss:$16 sps:$4 sm:$0xff]  }
  0x5a   :  { %1116 = vmatprep.subr.bf16.mxu0 %v4052_v0 }
  0x5d   :  { %1117 = vmatpush1.bf16.msra.mxu0 %v3600_v11  ;;  %v3679_v11 = vld [vmem:[#allocation3 + $0x280] ss:$16 sps:$4 sm:$0xff]  }
  0x5e   :  { %1118 = vmatprep.subr.bf16.mxu0 %v4052_v0 }
  0x61   :  { %1119 = vmatpush1.bf16.msra.mxu0 %v3601_v12  ;;  %v3680_v12 = vld [vmem:[#allocation3 + $0x2a4] ss:$16 sps:$4 sm:$0xff]  }
  0x62   :  { %1120 = vmatprep.subr.bf16.mxu0 %v4052_v0 }
  0x65   :  { %1121 = vmatpush1.bf16.msra.mxu0 %v3602_v13  ;;  %v3734_v13 = vld [vmem:[#allocation8] sm:$0xff]  }
  0x66   :  { %1122 = vmatprep.subr.bf16.mxu0 %v4052_v0  ;;  %3180 = vmatprep.subr.bf16.mxu1 %v3734_v13 }
  0x67   :  { %3188 = vmatpush3.bf16.msra.mxu1 %v3734_v13 }
  0x69   :  { %1123 = vmatpush1.bf16.msra.mxu0 %v3603_v14  ;;  %v3682_v14 = vld [vmem:[#allocation3 + $0x2a0] ss:$16 sps:$4 sm:$0xff]  }
  0x6a   :  { %1124 = vmatprep.subr.bf16.mxu0 %v4052_v0 }
  0x6d   :  { %1125 = vmatpush1.bf16.msra.mxu0 %v3604_v15  ;;  %v3684_v15 = vld [vmem:[#allocation3 + $0x2c4] ss:$16 sps:$4 sm:$0xff]  }
  0x6e   :  { %1126 = vmatprep.subr.bf16.mxu0 %v4052_v0 }
  0x71   :  { %1127 = vmatpush1.bf16.msra.mxu0 %v3605_v16  ;;  %v3686_v16 = vld [vmem:[#allocation3 + $0x2c0] ss:$16 sps:$4 sm:$0xff]  }
  0x72   :  { %1128 = vmatprep.subr.bf16.mxu0 %v4052_v0 }
  0x75   :  { %1129 = vmatpush1.bf16.msra.mxu0 %v3606_v17  ;;  %v3687_v17 = vld [vmem:[#allocation3 + $0x2e4] ss:$16 sps:$4 sm:$0xff]  }
  0x76   :  { %1387 = vmatprep.subr.bf16.mxu0 %v4052_v0 }
  0x78   :  { %1131 = vmatmul.mubr.bf16.vlgmr.msra.gmra.mrb[0].mxu0 %v3607_v18  ;;  %v3689_v18 = vld [vmem:[#allocation3 + $0x2e0] ss:$16 sps:$4 sm:$0xff]  }
  0x79   :  { %1138 = vmatprep.mubr.bf16.mxu0 %v3610_v19  ;;  %1388 = vmatpush1.bf16.msra.mxu0 %v3613_v20  ;;  %v3691_v19 = vld [vmem:[#allocation3 + $0x304] ss:$16 sps:$4 sm:$0xff]   ;;  %v3693_v20 = vld [vmem:[#allocation3 + $0x300] ss:$16 sps:$4 sm:$0xff]  }
  0x7a   :  { %1389 = vmatprep.subr.bf16.mxu0 %v4052_v0 }
  0x7d   :  { %1390 = vmatpush1.bf16.msra.mxu0 %v3620_v21  ;;  %v3694_v21 = vld [vmem:[#allocation3 + $0x324] ss:$16 sps:$4 sm:$0xff]  }
  0x7e   :  { %1391 = vmatprep.subr.bf16.mxu0 %v4052_v0 }
  0x80   :  { %1139 = vmatmul.mubr.bf16.gmra.mrb[4].mxu0 %v3612_v22  ;;  %v3747_v22 = vld [vmem:[#allocation8 + $0x8] sm:$0xff]  }
  0x81   :  { %1146 = vmatprep.mubr.bf16.mxu0 %v3614_v23  ;;  %1392 = vmatpush1.bf16.msra.mxu0 %v3627_v24  ;;  %v3696_v23 = vld [vmem:[#allocation3 + $0x320] ss:$16 sps:$4 sm:$0xff]   ;;  %v3698_v24 = vld [vmem:[#allocation3 + $0x344] ss:$16 sps:$4 sm:$0xff]  }
  0x82   :  { %1393 = vmatprep.subr.bf16.mxu0 %v4052_v0  ;;  %3181 = vmatprep.subr.bf16.mxu1 %v3747_v22 }
  0x83   :  { %3189 = vmatpush3.bf16.msra.mxu1 %v3747_v22 }
  0x85   :  { %1394 = vmatpush1.bf16.msra.mxu0 %v3634_v25  ;;  %v3700_v25 = vld [vmem:[#allocation3 + $0x340] ss:$16 sps:$4 sm:$0xff]  }
  0x86   :  { %1395 = vmatprep.subr.bf16.mxu0 %v4052_v0 }
  0x88   :  { %1147 = vmatmul.mubr.bf16.gmra.mrb[8].mxu0 %v3616_v26  ;;  %v3701_v26 = vld [vmem:[#allocation3 + $0x364] ss:$16 sps:$4 sm:$0xff]  }
  0x89   :  { %1154 = vmatprep.mubr.bf16.mxu0 %v3617_v27  ;;  %1396 = vmatpush1.bf16.msra.mxu0 %v3641_v28  ;;  %v3703_v27 = vld [vmem:[#allocation3 + $0x360] ss:$16 sps:$4 sm:$0xff]   ;;  %v3705_v28 = vld [vmem:[#allocation3 + $0x384] ss:$16 sps:$4 sm:$0xff]  }
  0x8a   :  { %1397 = vmatprep.subr.bf16.mxu0 %v4052_v0 }
  0x8d   :  { %1398 = vmatpush1.bf16.msra.mxu0 %v3648_v29  ;;  %v3707_v29 = vld [vmem:[#allocation3 + $0x380] ss:$16 sps:$4 sm:$0xff]  }
  0x8e   :  { %1399 = vmatprep.subr.bf16.mxu0 %v4052_v0 }
  0x90   :  { %1155 = vmatmul.mubr.bf16.gmra.mrb[12].mxu0 %v3619_v30  ;;  %v3708_v30 = vld [vmem:[#allocation3 + $0x3a4] ss:$16 sps:$4 sm:$0xff]  }
  0x91   :  { %1162 = vmatprep.mubr.bf16.mxu0 %v3621_v31  ;;  %1400 = vmatpush1.bf16.msra.mxu0 %v3655_v32  ;;  %v3760_v31 = vld [vmem:[#allocation8 + $0x10] sm:$0xff]  }
  0x92   :  { %1401 = vmatprep.subr.bf16.mxu0 %v4052_v0  ;;  %3182 = vmatprep.subr.bf16.mxu1 %v3760_v31  ;;  %v3710_v32 = vld [vmem:[#allocation3 + $0x3a0] ss:$16 sps:$4 sm:$0xff]  }
  0x93   :  { %3190 = vmatpush3.bf16.msra.mxu1 %v3760_v31 }
  0x95   :  { %1402 = vmatpush1.bf16.msra.mxu0 %v3662_v33  ;;  %v3712_v33 = vld [vmem:[#allocation3 + $0x3c4] ss:$16 sps:$4 sm:$0xff]  }
  0x96   :  { %1403 = vmatprep.subr.bf16.mxu0 %v4052_v0 }
  0x98   :  { %1163 = vmatmul.mubr.bf16.gmra.mrb[16].mxu0 %v3623_v34  ;;  %v3714_v34 = vld [vmem:[#allocation3 + $0x3c0] ss:$16 sps:$4 sm:$0xff]  }
  0x99   :  { %1170 = vmatprep.mubr.bf16.mxu0 %v3624_v35  ;;  %1404 = vmatpush1.bf16.msra.mxu0 %v3669_v36  ;;  %v3715_v35 = vld [vmem:[#allocation3 + $0x3e4] ss:$16 sps:$4 sm:$0xff]   ;;  %v3717_v36 = vld [vmem:[#allocation3 + $0x3e0] ss:$16 sps:$4 sm:$0xff]  }
  0x9a   :  { %1405 = vmatprep.subr.bf16.mxu0 %v4052_v0 }
  0x9d   :  { %1406 = vmatpush1.bf16.msra.mxu0 %v3676_v37  ;;  %v3721_v37 = vld [vmem:[#allocation3 + $0xc] ss:$16 sps:$4 sm:$0xff]  }
  0x9e   :  { %1407 = vmatprep.subr.bf16.mxu0 %v4052_v0 }
  0xa0   :  { %1171 = vmatmul.mubr.bf16.gmra.mrb[20].mxu0 %v3626_v38  ;;  %v3719_v38 = vld [vmem:[#allocation3 + $0x8] ss:$16 sps:$4 sm:$0xff]  }
  0xa1   :  { %1178 = vmatprep.mubr.bf16.mxu0 %v3628_v39  ;;  %1408 = vmatpush1.bf16.msra.mxu0 %v3683_v40  ;;  %v3722_v39 = vld [vmem:[#allocation3 + $0x2c] ss:$16 sps:$4 sm:$0xff]  }
  0xa2   :  { %1409 = vmatprep.subr.bf16.mxu0 %v4052_v0  ;;  %v3773_v40 = vld [vmem:[#allocation8 + $0x18] sm:$0xff]  }
  0xa3   :  { %3183 = vmatprep.subr.bf16.mxu1 %v3773_v40 }
  0xa4   :  { %3191 = vmatpush3.bf16.msra.mxu1 %v3773_v40 }
  0xa5   :  { %1410 = vmatpush1.bf16.msra.mxu0 %v3690_v45  ;;  %v3730_v45 = vld [vmem:[#allocation3 + $0x68] ss:$16 sps:$4 sm:$0xff]  }
  0xa6   :  { %1411 = vmatprep.subr.bf16.mxu0 %v4052_v0 }
  0xa8   :  { %1179 = vmatmul.mubr.bf16.gmra.mrb[24].mxu0 %v3630_v41  ;;  %v3724_v41 = vld [vmem:[#allocation3 + $0x28] ss:$16 sps:$4 sm:$0xff]  }
  0xa9   :  { %1186 = vmatprep.mubr.bf16.mxu0 %v3631_v42  ;;  %1412 = vmatpush1.bf16.msra.mxu0 %v3697_v50  ;;  %v3725_v42 = vld [vmem:[#allocation3 + $0x4c] ss:$16 sps:$4 sm:$0xff]   ;;  %v3737_v50 = vld [vmem:[#allocation3 + $0xa8] ss:$16 sps:$4 sm:$0xff]  }
  0xaa   :  { %1413 = vmatprep.subr.bf16.mxu0 %v4052_v0 }
  0xad   :  { %1414 = vmatpush1.bf16.msra.mxu0 %v3704_v55  ;;  %v3744_v55 = vld [vmem:[#allocation3 + $0x10c] ss:$16 sps:$4 sm:$0xff]  }
  0xae   :  { %1415 = vmatprep.subr.bf16.mxu0 %v4052_v0 }
  0xb0   :  { %1187 = vmatmul.mubr.bf16.gmra.mrb[28].mxu0 %v3633_v43  ;;  %v3727_v43 = vld [vmem:[#allocation3 + $0x48] ss:$16 sps:$4 sm:$0xff]  }
  0xb1   :  { %1194 = vmatprep.mubr.bf16.mxu0 %v3635_v44  ;;  %1416 = vmatpush1.bf16.msra.mxu0 %v3711_v60  ;;  %v3728_v44 = vld [vmem:[#allocation3 + $0x6c] ss:$16 sps:$4 sm:$0xff]  }
  0xb2   :  { %1417 = vmatprep.subr.bf16.mxu0 %v4052_v0  ;;  %v3751_v60 = vld [vmem:[#allocation3 + $0x14c] ss:$16 sps:$4 sm:$0xff]  }
  0xb5   :  { %1418 = vmatpush1.bf16.msra.mxu0 %v3718_v2  ;;  %v3759_v2 = vld [vmem:[#allocation3 + $0x188] ss:$16 sps:$4 sm:$0xff]  }
  0xb6   :  { %3100 = vmatprep.subr.bf16.mxu0 %v3734_v13 }
  0xb8   :  { %1195 = vmatmul.mubr.bf16.gmra.mrb[32].mxu0 %v3637_v46  ;;  %v3731_v46 = vld [vmem:[#allocation3 + $0x8c] ss:$16 sps:$4 sm:$0xff]  }
  0xb9   :  { %1202 = vmatprep.mubr.bf16.mxu0 %v3638_v47  ;;  %v3733_v47 = vld [vmem:[#allocation3 + $0x88] ss:$16 sps:$4 sm:$0xff]  }
  0xc0   :  { %1203 = vmatmul.mubr.bf16.gmra.mrb[36].mxu0 %v3640_v48  ;;  %v3735_v48 = vld [vmem:[#allocation3 + $0xac] ss:$16 sps:$4 sm:$0xff]  }
  0xc1   :  { %1210 = vmatprep.mubr.bf16.mxu0 %v3642_v49  ;;  %v3786_v49 = vld [vmem:[#allocation8 + $0x20] sm:$0xff]  }
  0xc2   :  { %3184 = vmatprep.subr.bf16.mxu1 %v3786_v49 }
  0xc3   :  { %3192 = vmatpush3.bf16.msra.mxu1 %v3786_v49 }
  0xc8   :  { %1211 = vmatmul.mubr.bf16.gmra.mrb[40].mxu0 %v3644_v51  ;;  %v3738_v51 = vld [vmem:[#allocation3 + $0xcc] ss:$16 sps:$4 sm:$0xff]  }
  0xc9   :  { %1218 = vmatprep.mubr.bf16.mxu0 %v3645_v52  ;;  %v3740_v52 = vld [vmem:[#allocation3 + $0xc8] ss:$16 sps:$4 sm:$0xff]  }
  0xd0   :  { %1219 = vmatmul.mubr.bf16.gmra.mrb[44].mxu0 %v3647_v53  ;;  %v3741_v53 = vld [vmem:[#allocation3 + $0xec] ss:$16 sps:$4 sm:$0xff]  }
  0xd1   :  { %1226 = vmatprep.mubr.bf16.mxu0 %v3649_v54  ;;  %v3743_v54 = vld [vmem:[#allocation3 + $0xe8] ss:$16 sps:$4 sm:$0xff]  }
  0xd8   :  { %1227 = vmatmul.mubr.bf16.gmra.mrb[48].mxu0 %v3651_v56  ;;  %v3746_v56 = vld [vmem:[#allocation3 + $0x108] ss:$16 sps:$4 sm:$0xff]  }
  0xd9   :  { %1234 = vmatprep.mubr.bf16.mxu0 %v3652_v57  ;;  %v3748_v57 = vld [vmem:[#allocation3 + $0x12c] ss:$16 sps:$4 sm:$0xff]  }
  0xe0   :  { %1235 = vmatmul.mubr.bf16.gmra.mrb[52].mxu0 %v3654_v58  ;;  %v3799_v58 = vld [vmem:[#allocation8 + $0x28] sm:$0xff]  }
  0xe1   :  { %1242 = vmatprep.mubr.bf16.mxu0 %v3656_v59  ;;  %3185 = vmatprep.subr.bf16.mxu1 %v3799_v58  ;;  %v3750_v59 = vld [vmem:[#allocation3 + $0x128] ss:$16 sps:$4 sm:$0xff]  }
  0xe2   :  { %3193 = vmatpush3.bf16.msra.mxu1 %v3799_v58 }
  0xe8   :  { %1243 = vmatmul.mubr.bf16.gmra.mrb[56].mxu0 %v3658_v61  ;;  %v3753_v61 = vld [vmem:[#allocation3 + $0x148] ss:$16 sps:$4 sm:$0xff]  }
  0xe9   :  { %1250 = vmatprep.mubr.bf16.mxu0 %v3659_v62  ;;  %v3754_v62 = vld [vmem:[#allocation3 + $0x16c] ss:$16 sps:$4 sm:$0xff]  }
  0xf0   :  { %1251 = vmatmul.mubr.bf16.gmra.mrb[60].mxu0 %v3661_v63  ;;  %v3756_v63 = vld [vmem:[#allocation3 + $0x168] ss:$16 sps:$4 sm:$0xff]  }
  0xf1   :  { %1258 = vmatprep.mubr.bf16.mxu0 %v3663_v1  ;;  %v3757_v1 = vld [vmem:[#allocation3 + $0x18c] ss:$16 sps:$4 sm:$0xff]  }
  0xf8   :  { %1259 = vmatmul.mubr.bf16.gmra.mrb[64].mxu0 %v3665_v3  ;;  %v3761_v3 = vld [vmem:[#allocation3 + $0x1ac] ss:$16 sps:$4 sm:$0xff]  }
  0xf9   :  { %1266 = vmatprep.mubr.bf16.mxu0 %v3666_v4  ;;  %v3763_v4 = vld [vmem:[#allocation3 + $0x1a8] ss:$16 sps:$4 sm:$0xff]  }
 0x100   :  { %1267 = vmatmul.mubr.bf16.gmra.mrb[68].mxu0 %v3668_v5  ;;  %v3764_v5 = vld [vmem:[#allocation3 + $0x1cc] ss:$16 sps:$4 sm:$0xff]  }
 0x101   :  { %1274 = vmatprep.mubr.bf16.mxu0 %v3670_v6  ;;  %v3812_v6 = vld [vmem:[#allocation8 + $0x30] sm:$0xff]  }
 0x102   :  { %3186 = vmatprep.subr.bf16.mxu1 %v3812_v6 }
 0x103   :  { %3194 = vmatpush3.bf16.msra.mxu1 %v3812_v6 }
 0x108   :  { %1275 = vmatmul.mubr.bf16.gmra.mrb[72].mxu0 %v3672_v7  ;;  %v3766_v7 = vld [vmem:[#allocation3 + $0x1c8] ss:$16 sps:$4 sm:$0xff]  }
 0x109   :  { %1282 = vmatprep.mubr.bf16.mxu0 %v3673_v8  ;;  %v3767_v8 = vld [vmem:[#allocation3 + $0x1ec] ss:$16 sps:$4 sm:$0xff]  }
 0x110   :  { %1283 = vmatmul.mubr.bf16.gmra.mrb[76].mxu0 %v3675_v9  ;;  %v3769_v9 = vld [vmem:[#allocation3 + $0x1e8] ss:$16 sps:$4 sm:$0xff]  }
 0x111   :  { %1290 = vmatprep.mubr.bf16.mxu0 %v3677_v10  ;;  %v3770_v10 = vld [vmem:[#allocation3 + $0x20c] ss:$16 sps:$4 sm:$0xff]  }
 0x118   :  { %1291 = vmatmul.mubr.bf16.gmra.mrb[80].mxu0 %v3679_v11  ;;  %v3822_v11 = vld [vmem:[#allocation8 + $0x38] sm:$0xff]  }
 0x119   :  { %1298 = vmatprep.mubr.bf16.mxu0 %v3680_v12  ;;  %v3772_v12 = vld [vmem:[#allocation3 + $0x208] ss:$16 sps:$4 sm:$0xff]   ;;  %3187 = vmatprep.subr.bf16.mxu1 %v3822_v11 }
 0x11a   :  { %3195 = vmatpush3.bf16.msra.mxu1 %v3822_v11 }
 0x11b   :  { %2164 = vmatprep.subr.bf16.mxu1 %v4052_v0 }
 0x120   :  { %1299 = vmatmul.mubr.bf16.gmra.mrb[84].mxu0 %v3682_v14  ;;  %v3776_v14 = vld [vmem:[#allocation3 + $0x228] ss:$16 sps:$4 sm:$0xff]  }
 0x121   :  { %1306 = vmatprep.mubr.bf16.mxu0 %v3684_v15  ;;  %v3777_v15 = vld [vmem:[#allocation3 + $0x24c] ss:$16 sps:$4 sm:$0xff]  }
 0x128   :  { %1307 = vmatmul.mubr.bf16.gmra.mrb[88].mxu0 %v3686_v16  ;;  %v3779_v16 = vld [vmem:[#allocation3 + $0x248] ss:$16 sps:$4 sm:$0xff]  }
 0x129   :  { %1314 = vmatprep.mubr.bf16.mxu0 %v3687_v17  ;;  %v3780_v17 = vld [vmem:[#allocation3 + $0x26c] ss:$16 sps:$4 sm:$0xff]  }
 0x130   :  { %1315 = vmatmul.mubr.bf16.gmra.mrb[92].mxu0 %v3689_v18  ;;  %v3782_v18 = vld [vmem:[#allocation3 + $0x268] ss:$16 sps:$4 sm:$0xff]  }
 0x131   :  { %1322 = vmatprep.mubr.bf16.mxu0 %v3691_v19  ;;  %v3783_v19 = vld [vmem:[#allocation3 + $0x28c] ss:$16 sps:$4 sm:$0xff]  }
 0x138   :  { %1323 = vmatmul.mubr.bf16.gmra.mrb[96].mxu0 %v3693_v20  ;;  %v3785_v20 = vld [vmem:[#allocation3 + $0x288] ss:$16 sps:$4 sm:$0xff]  }
 0x139   :  { %1330 = vmatprep.mubr.bf16.mxu0 %v3694_v21  ;;  %v3787_v21 = vld [vmem:[#allocation3 + $0x2ac] ss:$16 sps:$4 sm:$0xff]  }
 0x140   :  { %1331 = vmatmul.mubr.bf16.gmra.mrb[100].mxu0 %v3696_v23  ;;  %v3790_v23 = vld [vmem:[#allocation3 + $0x2cc] ss:$16 sps:$4 sm:$0xff]  }
 0x141   :  { %1338 = vmatprep.mubr.bf16.mxu0 %v3698_v24  ;;  %v3792_v24 = vld [vmem:[#allocation3 + $0x2c8] ss:$16 sps:$4 sm:$0xff]  }
 0x148   :  { %1339 = vmatmul.mubr.bf16.gmra.mrb[104].mxu0 %v3700_v25  ;;  %v3793_v25 = vld [vmem:[#allocation3 + $0x2ec] ss:$16 sps:$4 sm:$0xff]  }
 0x149   :  { %1346 = vmatprep.mubr.bf16.mxu0 %v3701_v26  ;;  %v3795_v26 = vld [vmem:[#allocation3 + $0x2e8] ss:$16 sps:$4 sm:$0xff]  }
 0x150   :  { %1347 = vmatmul.mubr.bf16.gmra.mrb[108].mxu0 %v3703_v27  ;;  %v3796_v27 = vld [vmem:[#allocation3 + $0x30c] ss:$16 sps:$4 sm:$0xff]  }
 0x151   :  { %1354 = vmatprep.mubr.bf16.mxu0 %v3705_v28  ;;  %v3798_v28 = vld [vmem:[#allocation3 + $0x308] ss:$16 sps:$4 sm:$0xff]  }
 0x158   :  { %1355 = vmatmul.mubr.bf16.gmra.mrb[112].mxu0 %v3707_v29  ;;  %v3800_v29 = vld [vmem:[#allocation3 + $0x32c] ss:$16 sps:$4 sm:$0xff]  }
 0x159   :  { %1362 = vmatprep.mubr.bf16.mxu0 %v3708_v30  ;;  %v3802_v30 = vld [vmem:[#allocation3 + $0x328] ss:$16 sps:$4 sm:$0xff]  }
 0x160   :  { %1363 = vmatmul.mubr.bf16.gmra.mrb[116].mxu0 %v3710_v32  ;;  %v3805_v32 = vld [vmem:[#allocation3 + $0x348] ss:$16 sps:$4 sm:$0xff]  }
 0x161   :  { %1370 = vmatprep.mubr.bf16.mxu0 %v3712_v33  ;;  %v3806_v33 = vld [vmem:[#allocation3 + $0x36c] ss:$16 sps:$4 sm:$0xff]  }
 0x168   :  { %1371 = vmatmul.mubr.bf16.gmra.mrb[120].mxu0 %v3714_v34  ;;  %v4169_v34 = vld [vmem:[%s4419_s3] ss:$0 sm:$0xff] }
 0x169   :  { %1378 = vmatprep.mubr.bf16.mxu0 %v3715_v35 }
 0x170   :  { %1379 = vmatmul.mubr.bf16.gmra.mrb[124].mxu0 %v3717_v36 }
 0x171   :  { %1419 = vmatprep.mubr.bf16.mxu0 %v3721_v37 }
 0x178   :  { %1420 = vmatmul.mubr.bf16.vlgmr.msra.gmra.mrb[0].mxu0 %v3719_v38  ;;  %v3808_v38 = vld [vmem:[#allocation3 + $0x368] ss:$16 sps:$4 sm:$0xff]  }
 0x179   :  { %1427 = vmatprep.mubr.bf16.mxu0 %v3722_v39  ;;  %3101 = vmatpush3.bf16.msra.mxu0 %v3734_v13  ;;  %v3774_v13 = vld [vmem:[#allocation3 + $0x22c] ss:$16 sps:$4 sm:$0xff]  }
 0x17a   :  { %3102 = vmatprep.subr.bf16.mxu0 %v3747_v22 }
 0x17d   :  { %3103 = vmatpush3.bf16.msra.mxu0 %v3747_v22  ;;  %v3789_v22 = vld [vmem:[#allocation3 + $0x2a8] ss:$16 sps:$4 sm:$0xff]  }
 0x17e   :  { %3104 = vmatprep.subr.bf16.mxu0 %v3760_v31 }
 0x180   :  { %1428 = vmatmul.mubr.bf16.gmra.mrb[4].mxu0 %v3724_v41 }
 0x181   :  { %1435 = vmatprep.mubr.bf16.mxu0 %v3725_v42  ;;  %3105 = vmatpush3.bf16.msra.mxu0 %v3760_v31  ;;  %v3803_v31 = vld [vmem:[#allocation3 + $0x34c] ss:$16 sps:$4 sm:$0xff]  }
 0x182   :  { %3106 = vmatprep.subr.bf16.mxu0 %v3773_v40 }
 0x185   :  { %3107 = vmatpush3.bf16.msra.mxu0 %v3773_v40  ;;  %v3809_v40 = vld [vmem:[#allocation3 + $0x38c] ss:$16 sps:$4 sm:$0xff]  }
 0x186   :  { %3108 = vmatprep.subr.bf16.mxu0 %v3786_v49 }
 0x188   :  { %1436 = vmatmul.mubr.bf16.gmra.mrb[8].mxu0 %v3727_v43 }
 0x189   :  { %1443 = vmatprep.mubr.bf16.mxu0 %v3728_v44  ;;  %3109 = vmatpush3.bf16.msra.mxu0 %v3786_v49  ;;  %v3811_v49 = vld [vmem:[#allocation3 + $0x388] ss:$16 sps:$4 sm:$0xff]  }
 0x18a   :  { %3110 = vmatprep.subr.bf16.mxu0 %v3799_v58 }
 0x18d   :  { %3111 = vmatpush3.bf16.msra.mxu0 %v3799_v58 }
 0x18e   :  { %3112 = vmatprep.subr.bf16.mxu0 %v3812_v6 }
 0x190   :  { %1444 = vmatmul.mubr.bf16.gmra.mrb[12].mxu0 %v3730_v45 }
 0x191   :  { %1451 = vmatprep.mubr.bf16.mxu0 %v3731_v46  ;;  %3113 = vmatpush3.bf16.msra.mxu0 %v3812_v6 }
 0x192   :  { %3114 = vmatprep.subr.bf16.mxu0 %v3822_v11 }
 0x195   :  { %3115 = vmatpush3.bf16.msra.mxu0 %v3822_v11 }
 0x198   :  { %1452 = vmatmul.mubr.bf16.gmra.mrb[16].mxu0 %v3733_v47 }
 0x199   :  { %1459 = vmatprep.mubr.bf16.mxu0 %v3735_v48 }
 0x1a0   :  { %1460 = vmatmul.mubr.bf16.gmra.mrb[20].mxu0 %v3737_v50 }
 0x1a1   :  { %1467 = vmatprep.mubr.bf16.mxu0 %v3738_v51  ;;  %v3813_v51 = vld [vmem:[#allocation3 + $0x3ac] ss:$16 sps:$4 sm:$0xff]  }
 0x1a8   :  { %1468 = vmatmul.mubr.bf16.gmra.mrb[24].mxu0 %v3740_v52 }
 0x1a9   :  { %1475 = vmatprep.mubr.bf16.mxu0 %v3741_v53 }
 0x1b0   :  { %1476 = vmatmul.mubr.bf16.gmra.mrb[28].mxu0 %v3743_v54 }
 0x1b1   :  { %1483 = vmatprep.mubr.bf16.mxu0 %v3744_v55 }
 0x1b8   :  { %1484 = vmatmul.mubr.bf16.gmra.mrb[32].mxu0 %v3746_v56 }
 0x1b9   :  { %1491 = vmatprep.mubr.bf16.mxu0 %v3748_v57 }
 0x1c0   :  { %1492 = vmatmul.mubr.bf16.gmra.mrb[36].mxu0 %v3750_v59 }
 0x1c1   :  { %1499 = vmatprep.mubr.bf16.mxu0 %v3751_v60  ;;  %v3815_v60 = vld [vmem:[#allocation3 + $0x3a8] ss:$16 sps:$4 sm:$0xff]  }
 0x1c8   :  { %1500 = vmatmul.mubr.bf16.gmra.mrb[40].mxu0 %v3753_v61 }
 0x1c9   :  { %1507 = vmatprep.mubr.bf16.mxu0 %v3754_v62  ;;  %v3816_v62 = vld [vmem:[#allocation3 + $0x3cc] ss:$16 sps:$4 sm:$0xff]  }
 0x1d0   :  { %1508 = vmatmul.mubr.bf16.gmra.mrb[44].mxu0 %v3756_v63 }
 0x1d1   :  { %1515 = vmatprep.mubr.bf16.mxu0 %v3757_v1 }
 0x1d8   :  { %1516 = vmatmul.mubr.bf16.gmra.mrb[48].mxu0 %v3759_v2 }
 0x1d9   :  { %1523 = vmatprep.mubr.bf16.mxu0 %v3761_v3 }
 0x1e0   :  { %1524 = vmatmul.mubr.bf16.gmra.mrb[52].mxu0 %v3763_v4 }
 0x1e1   :  { %1531 = vmatprep.mubr.bf16.mxu0 %v3764_v5 }
 0x1e8   :  { %1532 = vmatmul.mubr.bf16.gmra.mrb[56].mxu0 %v3766_v7 }
 0x1e9   :  { %1539 = vmatprep.mubr.bf16.mxu0 %v3767_v8  ;;  %v3818_v8 = vld [vmem:[#allocation3 + $0x3c8] ss:$16 sps:$4 sm:$0xff]  }
 0x1f0   :  { %1540 = vmatmul.mubr.bf16.gmra.mrb[60].mxu0 %v3769_v9 }
 0x1f1   :  { %1547 = vmatprep.mubr.bf16.mxu0 %v3770_v10  ;;  %v3819_v10 = vld [vmem:[#allocation3 + $0x3ec] ss:$16 sps:$4 sm:$0xff]  }
 0x1f8   :  { %1548 = vmatmul.mubr.bf16.gmra.mrb[64].mxu0 %v3772_v12 }
 0x1f9   :  { %1555 = vmatprep.mubr.bf16.mxu0 %v3774_v13 }
 0x200   :  { %1556 = vmatmul.mubr.bf16.gmra.mrb[68].mxu0 %v3776_v14 }
 0x201   :  { %1563 = vmatprep.mubr.bf16.mxu0 %v3777_v15 }
 0x208   :  { %1564 = vmatmul.mubr.bf16.gmra.mrb[72].mxu0 %v3779_v16 }
 0x209   :  { %1571 = vmatprep.mubr.bf16.mxu0 %v3780_v17 }
 0x210   :  { %1572 = vmatmul.mubr.bf16.gmra.mrb[76].mxu0 %v3782_v18 }
 0x211   :  { %1579 = vmatprep.mubr.bf16.mxu0 %v3783_v19  ;;  %v3821_v19 = vld [vmem:[#allocation3 + $0x3e8] ss:$16 sps:$4 sm:$0xff]  }
 0x218   :  { %1580 = vmatmul.mubr.bf16.gmra.mrb[80].mxu0 %v3785_v20 }
 0x219   :  { %1587 = vmatprep.mubr.bf16.mxu0 %v3787_v21 }
 0x220   :  { %1588 = vmatmul.mubr.bf16.gmra.mrb[84].mxu0 %v3789_v22 }
 0x221   :  { %1595 = vmatprep.mubr.bf16.mxu0 %v3790_v23 }
 0x228   :  { %1596 = vmatmul.mubr.bf16.gmra.mrb[88].mxu0 %v3792_v24 }
 0x229   :  { %1603 = vmatprep.mubr.bf16.mxu0 %v3793_v25 }
 0x230   :  { %1604 = vmatmul.mubr.bf16.gmra.mrb[92].mxu0 %v3795_v26 }
 0x231   :  { %1611 = vmatprep.mubr.bf16.mxu0 %v3796_v27 }
 0x238   :  { %1612 = vmatmul.mubr.bf16.gmra.mrb[96].mxu0 %v3798_v28 }
 0x239   :  { %1619 = vmatprep.mubr.bf16.mxu0 %v3800_v29 }
 0x240   :  { %1620 = vmatmul.mubr.bf16.gmra.mrb[100].mxu0 %v3802_v30 }
 0x241   :  { %1627 = vmatprep.mubr.bf16.mxu0 %v3803_v31 }
 0x248   :  { %1628 = vmatmul.mubr.bf16.gmra.mrb[104].mxu0 %v3805_v32 }
 0x249   :  { %1635 = vmatprep.mubr.bf16.mxu0 %v3806_v33 }
 0x24b   :  { %v1421_v35 = vpop.f32.mrb[0].mxu0 }
 0x24c   :  { %v3196_v36 = vadd.f32 %v4169_v34, %v1421_v35  ;;  %v1423_v37 = vpop.f32.mrb[1].mxu0 }
 0x24d   :  { %v1424_v39 = vpop.f32.mrb[2].mxu0 }
 0x24e   :  { %v3197_v41 = vadd.f32 %v4169_v34, %v1424_v39  ;;  %v1426_v42 = vpop.f32.mrb[3].mxu0  ;;  %v1676_v43 = vmax.f32 %v3196_v36, 0.0 }
 0x250   :  { %v1677_v44 = vmax.f32 %v3197_v41, 0.0  ;;  %1636 = vmatmul.mubr.bf16.gmra.mrb[108].mxu0 %v3808_v38 }
 0x251   :  { %1643 = vmatprep.mubr.bf16.mxu0 %v3809_v40 }
 0x252   :  { %v1740_v45 = vpack.c.bf16 %v1677_v44, %v1676_v43 }
 0x253   :  { %v1429_v46 = vpop.f32.mrb[4].mxu0 }
 0x254   :  { %v3198_v47 = vadd.f32 %v4169_v34, %v1429_v46  ;;  %v1431_v48 = vpop.f32.mrb[5].mxu0 }
 0x255   :  { %v1432_v50 = vpop.f32.mrb[6].mxu0 }
 0x256   :  { %v3199_v52 = vadd.f32 %v4169_v34, %v1432_v50  ;;  %v1434_v53 = vpop.f32.mrb[7].mxu0  ;;  %v1678_v54 = vmax.f32 %v3198_v47, 0.0 }
 0x258   :  { %v1679_v55 = vmax.f32 %v3199_v52, 0.0  ;;  %1644 = vmatmul.mubr.bf16.gmra.mrb[112].mxu0 %v3811_v49 }
 0x259   :  { %1651 = vmatprep.mubr.bf16.mxu0 %v3813_v51 }
 0x25a   :  { %v1741_v56 = vpack.c.bf16 %v1679_v55, %v1678_v54 }
 0x25b   :  { %v1437_v57 = vpop.f32.mrb[8].mxu0 }
 0x25c   :  { %v3200_v58 = vadd.f32 %v4169_v34, %v1437_v57  ;;  %v1439_v59 = vpop.f32.mrb[9].mxu0 }
 0x25d   :  { %v1440_v61 = vpop.f32.mrb[10].mxu0 }
 0x25e   :  { %v3201_v63 = vadd.f32 %v4169_v34, %v1440_v61  ;;  %v1442_v1 = vpop.f32.mrb[11].mxu0  ;;  %v1680_v2 = vmax.f32 %v3200_v58, 0.0 }
 0x260   :  { %v1681_v3 = vmax.f32 %v3201_v63, 0.0  ;;  %1652 = vmatmul.mubr.bf16.gmra.mrb[116].mxu0 %v3815_v60 }
 0x261   :  { %1659 = vmatprep.mubr.bf16.mxu0 %v3816_v62 }
 0x262   :  { %v1742_v4 = vpack.c.bf16 %v1681_v3, %v1680_v2 }
 0x263   :  { %v1445_v5 = vpop.f32.mrb[12].mxu0 }
 0x264   :  { %v3202_v6 = vadd.f32 %v4169_v34, %v1445_v5  ;;  %v1447_v7 = vpop.f32.mrb[13].mxu0 }
 0x265   :  { %v1448_v9 = vpop.f32.mrb[14].mxu0 }
 0x266   :  { %v3203_v11 = vadd.f32 %v4169_v34, %v1448_v9  ;;  %v1450_v12 = vpop.f32.mrb[15].mxu0  ;;  %v1682_v13 = vmax.f32 %v3202_v6, 0.0 }
 0x268   :  { %v1683_v14 = vmax.f32 %v3203_v11, 0.0  ;;  %1660 = vmatmul.mubr.bf16.gmra.mrb[120].mxu0 %v3818_v8 }
 0x269   :  { %1667 = vmatprep.mubr.bf16.mxu0 %v3819_v10 }
 0x26a   :  { %v1743_v15 = vpack.c.bf16 %v1683_v14, %v1682_v13 }
 0x26b   :  { %v1453_v16 = vpop.f32.mrb[16].mxu0 }
 0x26c   :  { %v3204_v17 = vadd.f32 %v4169_v34, %v1453_v16  ;;  %v1455_v18 = vpop.f32.mrb[17].mxu0 }
 0x26d   :  { %v1456_v20 = vpop.f32.mrb[18].mxu0 }
 0x26e   :  { %v3205_v21 = vadd.f32 %v4169_v34, %v1456_v20  ;;  %v1458_v22 = vpop.f32.mrb[19].mxu0  ;;  %v1684_v23 = vmax.f32 %v3204_v17, 0.0 }
 0x270   :  { %v1685_v24 = vmax.f32 %v3205_v21, 0.0  ;;  %1668 = vmatmul.mubr.bf16.gmra.mrb[124].mxu0 %v3821_v19 }
 0x271   :  { %3116 = vmatprep.mubr.bf16.mxu0 %v1740_v45 }
 0x272   :  { %v1744_v25 = vpack.c.bf16 %v1685_v24, %v1684_v23 }
 0x273   :  { %v1461_v26 = vpop.f32.mrb[20].mxu0 }
 0x274   :  { %v3206_v27 = vadd.f32 %v4169_v34, %v1461_v26  ;;  %v1463_v28 = vpop.f32.mrb[21].mxu0 }
 0x275   :  { %v1464_v29 = vpop.f32.mrb[22].mxu0 }
 0x276   :  { %v3207_v30 = vadd.f32 %v4169_v34, %v1464_v29  ;;  %v1466_v31 = vpop.f32.mrb[23].mxu0  ;;  %v1686_v32 = vmax.f32 %v3206_v27, 0.0 }
 0x278   :  { %v1687_v33 = vmax.f32 %v3207_v30, 0.0  ;;  %3117 = vmatmul.mubr.bf16.vlgmr.msra.gmra.mrb[128].mxu0 %v1741_v56 }
 0x279   :  { %3120 = vmatprep.mubr.bf16.mxu0 %v1742_v4 }
 0x27a   :  { %v1745_v35 = vpack.c.bf16 %v1687_v33, %v1686_v32 }
 0x27b   :  { %v1469_v36 = vpop.f32.mrb[24].mxu0 }
 0x27c   :  { %v3208_v37 = vadd.f32 %v4169_v34, %v1469_v36  ;;  %v1471_v38 = vpop.f32.mrb[25].mxu0 }
 0x27d   :  { %v1472_v39 = vpop.f32.mrb[26].mxu0 }
 0x27e   :  { %v3209_v40 = vadd.f32 %v4169_v34, %v1472_v39  ;;  %v1474_v41 = vpop.f32.mrb[27].mxu0  ;;  %v1688_v42 = vmax.f32 %v3208_v37, 0.0 }
 0x280   :  { %v1689_v43 = vmax.f32 %v3209_v40, 0.0  ;;  %3121 = vmatmul.mubr.bf16.gmra.mrb[132].mxu0 %v1743_v15 }
 0x281   :  { %3124 = vmatprep.mubr.bf16.mxu0 %v1744_v25 }
 0x282   :  { %v1746_v44 = vpack.c.bf16 %v1689_v43, %v1688_v42 }
 0x283   :  { %v1477_v45 = vpop.f32.mrb[28].mxu0 }
 0x284   :  { %v3210_v46 = vadd.f32 %v4169_v34, %v1477_v45  ;;  %v1479_v47 = vpop.f32.mrb[29].mxu0 }
 0x285   :  { %v1480_v48 = vpop.f32.mrb[30].mxu0 }
 0x286   :  { %v3211_v49 = vadd.f32 %v4169_v34, %v1480_v48  ;;  %v1482_v50 = vpop.f32.mrb[31].mxu0  ;;  %v1690_v51 = vmax.f32 %v3210_v46, 0.0 }
 0x288   :  { %v1691_v52 = vmax.f32 %v3211_v49, 0.0  ;;  %3125 = vmatmul.mubr.bf16.gmra.mrb[136].mxu0 %v1745_v35 }
 0x289   :  { %3128 = vmatprep.mubr.bf16.mxu0 %v1746_v44 }
 0x28a   :  { %v1747_v53 = vpack.c.bf16 %v1691_v52, %v1690_v51 }
 0x28b   :  { %v1485_v54 = vpop.f32.mrb[32].mxu0 }
 0x28c   :  { %v3212_v55 = vadd.f32 %v4169_v34, %v1485_v54  ;;  %v1487_v56 = vpop.f32.mrb[33].mxu0 }
 0x28d   :  { %v1488_v57 = vpop.f32.mrb[34].mxu0 }
 0x28e   :  { %v3213_v58 = vadd.f32 %v4169_v34, %v1488_v57  ;;  %v1490_v59 = vpop.f32.mrb[35].mxu0  ;;  %v1692_v60 = vmax.f32 %v3212_v55, 0.0 }
 0x290   :  { %v1693_v61 = vmax.f32 %v3213_v58, 0.0  ;;  %3129 = vmatmul.mubr.bf16.gmra.mrb[140].mxu0 %v1747_v53 }
 0x292   :  { %v1748_v62 = vpack.c.bf16 %v1693_v61, %v1692_v60 }
 0x293   :  { %v1493_v63 = vpop.f32.mrb[36].mxu0 }
 0x294   :  { %v3214_v1 = vadd.f32 %v4169_v34, %v1493_v63  ;;  %v1495_v2 = vpop.f32.mrb[37].mxu0  ;;  %3132 = vmatprep.mubr.bf16.mxu0 %v1748_v62 }
 0x295   :  { %v1496_v3 = vpop.f32.mrb[38].mxu0 }
 0x296   :  { %v3215_v4 = vadd.f32 %v4169_v34, %v1496_v3  ;;  %v1498_v5 = vpop.f32.mrb[39].mxu0  ;;  %v1694_v6 = vmax.f32 %v3214_v1, 0.0 }
 0x298   :  { %v1695_v7 = vmax.f32 %v3215_v4, 0.0 }
 0x29a   :  { %v1749_v8 = vpack.c.bf16 %v1695_v7, %v1694_v6 }
 0x29b   :  { %v1501_v9 = vpop.f32.mrb[40].mxu0 }
 0x29c   :  { %v3216_v10 = vadd.f32 %v4169_v34, %v1501_v9  ;;  %v1503_v11 = vpop.f32.mrb[41].mxu0  ;;  %3133 = vmatmul.mubr.bf16.gmra.mrb[144].mxu0 %v1749_v8 }
 0x29d   :  { %v1504_v12 = vpop.f32.mrb[42].mxu0 }
 0x29e   :  { %v3217_v13 = vadd.f32 %v4169_v34, %v1504_v12  ;;  %v1506_v14 = vpop.f32.mrb[43].mxu0  ;;  %v1696_v15 = vmax.f32 %v3216_v10, 0.0 }
 0x2a0   :  { %v1697_v16 = vmax.f32 %v3217_v13, 0.0 }
 0x2a2   :  { %v1750_v17 = vpack.c.bf16 %v1697_v16, %v1696_v15 }
 0x2a3   :  { %v1509_v18 = vpop.f32.mrb[44].mxu0 }
 0x2a4   :  { %v3218_v19 = vadd.f32 %v4169_v34, %v1509_v18  ;;  %v1511_v20 = vpop.f32.mrb[45].mxu0  ;;  %3136 = vmatprep.mubr.bf16.mxu0 %v1750_v17 }
 0x2a5   :  { %v1512_v21 = vpop.f32.mrb[46].mxu0 }
 0x2a6   :  { %v3219_v22 = vadd.f32 %v4169_v34, %v1512_v21  ;;  %v1514_v23 = vpop.f32.mrb[47].mxu0  ;;  %v1698_v24 = vmax.f32 %v3218_v19, 0.0 }
 0x2a8   :  { %v1699_v25 = vmax.f32 %v3219_v22, 0.0 }
 0x2aa   :  { %v1751_v26 = vpack.c.bf16 %v1699_v25, %v1698_v24 }
 0x2ab   :  { %v1517_v27 = vpop.f32.mrb[48].mxu0 }
 0x2ac   :  { %v3220_v28 = vadd.f32 %v4169_v34, %v1517_v27  ;;  %v1519_v29 = vpop.f32.mrb[49].mxu0  ;;  %3137 = vmatmul.mubr.bf16.gmra.mrb[148].mxu0 %v1751_v26 }
 0x2ad   :  { %v1520_v30 = vpop.f32.mrb[50].mxu0 }
 0x2ae   :  { %v3221_v31 = vadd.f32 %v4169_v34, %v1520_v30  ;;  %v1522_v32 = vpop.f32.mrb[51].mxu0  ;;  %v1700_v33 = vmax.f32 %v3220_v28, 0.0 }
 0x2b0   :  { %v1701_v35 = vmax.f32 %v3221_v31, 0.0 }
 0x2b2   :  { %v1752_v36 = vpack.c.bf16 %v1701_v35, %v1700_v33 }
 0x2b3   :  { %v1525_v37 = vpop.f32.mrb[52].mxu0 }
 0x2b4   :  { %v3222_v38 = vadd.f32 %v4169_v34, %v1525_v37  ;;  %v1527_v39 = vpop.f32.mrb[53].mxu0  ;;  %3140 = vmatprep.mubr.bf16.mxu1 %v1752_v36 }
 0x2b5   :  { %v1528_v40 = vpop.f32.mrb[54].mxu0 }
 0x2b6   :  { %v3223_v41 = vadd.f32 %v4169_v34, %v1528_v40  ;;  %v1530_v42 = vpop.f32.mrb[55].mxu0  ;;  %v1702_v43 = vmax.f32 %v3222_v38, 0.0 }
 0x2b8   :  { %v1703_v44 = vmax.f32 %v3223_v41, 0.0 }
 0x2ba   :  { %v1753_v45 = vpack.c.bf16 %v1703_v44, %v1702_v43 }
 0x2bb   :  { %v1533_v46 = vpop.f32.mrb[56].mxu0 }
 0x2bc   :  { %v3224_v47 = vadd.f32 %v4169_v34, %v1533_v46  ;;  %v1535_v48 = vpop.f32.mrb[57].mxu0  ;;  %3141 = vmatmul.mubr.bf16.vlgmr.msra.gmra.mrb[0].mxu1 %v1753_v45 }
 0x2bd   :  { %v1536_v49 = vpop.f32.mrb[58].mxu0 }
 0x2be   :  { %v3225_v50 = vadd.f32 %v4169_v34, %v1536_v49  ;;  %v1538_v51 = vpop.f32.mrb[59].mxu0  ;;  %v1704_v52 = vmax.f32 %v3224_v47, 0.0 }
 0x2c0   :  { %v1705_v53 = vmax.f32 %v3225_v50, 0.0 }
 0x2c2   :  { %v1754_v54 = vpack.c.bf16 %v1705_v53, %v1704_v52 }
 0x2c3   :  { %v1541_v55 = vpop.f32.mrb[60].mxu0 }
 0x2c4   :  { %v3226_v56 = vadd.f32 %v4169_v34, %v1541_v55  ;;  %v1543_v57 = vpop.f32.mrb[61].mxu0  ;;  %3144 = vmatprep.mubr.bf16.mxu1 %v1754_v54 }
 0x2c5   :  { %v1544_v58 = vpop.f32.mrb[62].mxu0 }
 0x2c6   :  { %v3227_v59 = vadd.f32 %v4169_v34, %v1544_v58  ;;  %v1546_v60 = vpop.f32.mrb[63].mxu0  ;;  %v1706_v61 = vmax.f32 %v3226_v56, 0.0 }
 0x2c8   :  { %v1707_v62 = vmax.f32 %v3227_v59, 0.0 }
 0x2ca   :  { %v1755_v63 = vpack.c.bf16 %v1707_v62, %v1706_v61 }
 0x2cb   :  { %v1549_v1 = vpop.f32.mrb[64].mxu0 }
 0x2cc   :  { %v3228_v2 = vadd.f32 %v4169_v34, %v1549_v1  ;;  %v1551_v3 = vpop.f32.mrb[65].mxu0  ;;  %3145 = vmatmul.mubr.bf16.gmra.mrb[4].mxu1 %v1755_v63 }
 0x2cd   :  { %v1552_v4 = vpop.f32.mrb[66].mxu0 }
 0x2ce   :  { %v3229_v5 = vadd.f32 %v4169_v34, %v1552_v4  ;;  %v1554_v6 = vpop.f32.mrb[67].mxu0  ;;  %v1708_v7 = vmax.f32 %v3228_v2, 0.0 }
 0x2d0   :  { %v1709_v8 = vmax.f32 %v3229_v5, 0.0 }
 0x2d2   :  { %v1756_v9 = vpack.c.bf16 %v1709_v8, %v1708_v7 }
 0x2d3   :  { %v1557_v10 = vpop.f32.mrb[68].mxu0 }
 0x2d4   :  { %v3230_v11 = vadd.f32 %v4169_v34, %v1557_v10  ;;  %v1559_v12 = vpop.f32.mrb[69].mxu0  ;;  %3148 = vmatprep.mubr.bf16.mxu1 %v1756_v9 }
 0x2d5   :  { %v1560_v13 = vpop.f32.mrb[70].mxu0 }
 0x2d6   :  { %v3231_v14 = vadd.f32 %v4169_v34, %v1560_v13  ;;  %v1562_v15 = vpop.f32.mrb[71].mxu0  ;;  %v1710_v16 = vmax.f32 %v3230_v11, 0.0 }
 0x2d8   :  { %v1711_v17 = vmax.f32 %v3231_v14, 0.0 }
 0x2da   :  { %v1757_v18 = vpack.c.bf16 %v1711_v17, %v1710_v16 }
 0x2db   :  { %v1565_v19 = vpop.f32.mrb[72].mxu0 }
 0x2dc   :  { %v3232_v20 = vadd.f32 %v4169_v34, %v1565_v19  ;;  %v1567_v21 = vpop.f32.mrb[73].mxu0  ;;  %3149 = vmatmul.mubr.bf16.gmra.mrb[8].mxu1 %v1757_v18 }
 0x2dd   :  { %v1568_v22 = vpop.f32.mrb[74].mxu0 }
 0x2de   :  { %v3233_v23 = vadd.f32 %v4169_v34, %v1568_v22  ;;  %v1570_v24 = vpop.f32.mrb[75].mxu0  ;;  %v1712_v25 = vmax.f32 %v3232_v20, 0.0 }
 0x2e0   :  { %v1713_v26 = vmax.f32 %v3233_v23, 0.0 }
 0x2e2   :  { %v1758_v27 = vpack.c.bf16 %v1713_v26, %v1712_v25 }
 0x2e3   :  { %v1573_v28 = vpop.f32.mrb[76].mxu0 }
 0x2e4   :  { %v3234_v29 = vadd.f32 %v4169_v34, %v1573_v28  ;;  %v1575_v30 = vpop.f32.mrb[77].mxu0  ;;  %3152 = vmatprep.mubr.bf16.mxu1 %v1758_v27 }
 0x2e5   :  { %v1576_v31 = vpop.f32.mrb[78].mxu0 }
 0x2e6   :  { %v3235_v32 = vadd.f32 %v4169_v34, %v1576_v31  ;;  %v1578_v33 = vpop.f32.mrb[79].mxu0  ;;  %v1714_v35 = vmax.f32 %v3234_v29, 0.0 }
 0x2e8   :  { %v1715_v36 = vmax.f32 %v3235_v32, 0.0 }
 0x2ea   :  { %v1759_v37 = vpack.c.bf16 %v1715_v36, %v1714_v35 }
 0x2eb   :  { %v1581_v38 = vpop.f32.mrb[80].mxu0 }
 0x2ec   :  { %v3236_v39 = vadd.f32 %v4169_v34, %v1581_v38  ;;  %v1583_v40 = vpop.f32.mrb[81].mxu0  ;;  %3153 = vmatmul.mubr.bf16.gmra.mrb[12].mxu1 %v1759_v37 }
 0x2ed   :  { %v1584_v41 = vpop.f32.mrb[82].mxu0 }
 0x2ee   :  { %v3237_v42 = vadd.f32 %v4169_v34, %v1584_v41  ;;  %v1586_v43 = vpop.f32.mrb[83].mxu0  ;;  %v1716_v44 = vmax.f32 %v3236_v39, 0.0 }
 0x2f0   :  { %v1717_v45 = vmax.f32 %v3237_v42, 0.0 }
 0x2f2   :  { %v1760_v46 = vpack.c.bf16 %v1717_v45, %v1716_v44 }
 0x2f3   :  { %v1589_v47 = vpop.f32.mrb[84].mxu0 }
 0x2f4   :  { %v3238_v48 = vadd.f32 %v4169_v34, %v1589_v47  ;;  %v1591_v49 = vpop.f32.mrb[85].mxu0  ;;  %3156 = vmatprep.mubr.bf16.mxu1 %v1760_v46 }
 0x2f5   :  { %v1592_v50 = vpop.f32.mrb[86].mxu0 }
 0x2f6   :  { %v3239_v51 = vadd.f32 %v4169_v34, %v1592_v50  ;;  %v1594_v52 = vpop.f32.mrb[87].mxu0  ;;  %v1718_v53 = vmax.f32 %v3238_v48, 0.0 }
 0x2f8   :  { %v1719_v54 = vmax.f32 %v3239_v51, 0.0 }
 0x2fa   :  { %v1761_v55 = vpack.c.bf16 %v1719_v54, %v1718_v53 }
 0x2fb   :  { %v1597_v56 = vpop.f32.mrb[88].mxu0 }
 0x2fc   :  { %v3240_v57 = vadd.f32 %v4169_v34, %v1597_v56  ;;  %v1599_v58 = vpop.f32.mrb[89].mxu0  ;;  %3157 = vmatmul.mubr.bf16.gmra.mrb[16].mxu1 %v1761_v55 }
 0x2fd   :  { %v1600_v59 = vpop.f32.mrb[90].mxu0 }
 0x2fe   :  { %v3241_v60 = vadd.f32 %v4169_v34, %v1600_v59  ;;  %v1602_v61 = vpop.f32.mrb[91].mxu0  ;;  %v1720_v62 = vmax.f32 %v3240_v57, 0.0 }
 0x300   :  { %v1721_v63 = vmax.f32 %v3241_v60, 0.0 }
 0x302   :  { %v1762_v1 = vpack.c.bf16 %v1721_v63, %v1720_v62 }
 0x303   :  { %v1605_v2 = vpop.f32.mrb[92].mxu0 }
 0x304   :  { %v3242_v3 = vadd.f32 %v4169_v34, %v1605_v2  ;;  %v1607_v4 = vpop.f32.mrb[93].mxu0  ;;  %3160 = vmatprep.mubr.bf16.mxu1 %v1762_v1 }
 0x305   :  { %v1608_v5 = vpop.f32.mrb[94].mxu0 }
 0x306   :  { %v3243_v6 = vadd.f32 %v4169_v34, %v1608_v5  ;;  %v1610_v7 = vpop.f32.mrb[95].mxu0  ;;  %v1722_v8 = vmax.f32 %v3242_v3, 0.0 }
 0x308   :  { %v1723_v9 = vmax.f32 %v3243_v6, 0.0 }
 0x30a   :  { %v1763_v10 = vpack.c.bf16 %v1723_v9, %v1722_v8 }
 0x30b   :  { %v1613_v11 = vpop.f32.mrb[96].mxu0 }
 0x30c   :  { %v3244_v12 = vadd.f32 %v4169_v34, %v1613_v11  ;;  %v1615_v13 = vpop.f32.mrb[97].mxu0  ;;  %3161 = vmatmul.mubr.bf16.gmra.mrb[20].mxu1 %v1763_v10 }
 0x30d   :  { %v1616_v14 = vpop.f32.mrb[98].mxu0 }
 0x30e   :  { %v3245_v15 = vadd.f32 %v4169_v34, %v1616_v14  ;;  %v1618_v16 = vpop.f32.mrb[99].mxu0  ;;  %v1724_v17 = vmax.f32 %v3244_v12, 0.0 }
 0x310   :  { %v1725_v18 = vmax.f32 %v3245_v15, 0.0 }
 0x312   :  { %v1764_v19 = vpack.c.bf16 %v1725_v18, %v1724_v17 }
 0x313   :  { %v1621_v20 = vpop.f32.mrb[100].mxu0 }
 0x314   :  { %v3246_v21 = vadd.f32 %v4169_v34, %v1621_v20  ;;  %v1623_v22 = vpop.f32.mrb[101].mxu0  ;;  %3164 = vmatprep.mubr.bf16.mxu1 %v1764_v19 }
 0x315   :  { %v1624_v23 = vpop.f32.mrb[102].mxu0 }
 0x316   :  { %v3247_v24 = vadd.f32 %v4169_v34, %v1624_v23  ;;  %v1626_v25 = vpop.f32.mrb[103].mxu0  ;;  %v1726_v26 = vmax.f32 %v3246_v21, 0.0 }
 0x318   :  { %v1727_v27 = vmax.f32 %v3247_v24, 0.0  ;;  %v3823_v24 = vld [vmem:[#allocation3 + $0x4] ss:$16 sps:$4 sm:$0xff]  }
 0x31a   :  { %v1765_v28 = vpack.c.bf16 %v1727_v27, %v1726_v26 }
 0x31b   :  { %v1629_v29 = vpop.f32.mrb[104].mxu0 }
 0x31c   :  { %v3248_v30 = vadd.f32 %v4169_v34, %v1629_v29  ;;  %v1631_v31 = vpop.f32.mrb[105].mxu0  ;;  %3165 = vmatmul.mubr.bf16.gmra.mrb[24].mxu1 %v1765_v28 }
 0x31d   :  { %v1632_v32 = vpop.f32.mrb[106].mxu0 }
 0x31e   :  { %v3249_v33 = vadd.f32 %v4169_v34, %v1632_v32  ;;  %v1634_v35 = vpop.f32.mrb[107].mxu0  ;;  %v1728_v36 = vmax.f32 %v3248_v30, 0.0 }
 0x320   :  { %v1729_v37 = vmax.f32 %v3249_v33, 0.0 }
 0x322   :  { %v1766_v38 = vpack.c.bf16 %v1729_v37, %v1728_v36 }
 0x323   :  { %v1637_v39 = vpop.f32.mrb[108].mxu0 }
 0x324   :  { %v3250_v40 = vadd.f32 %v4169_v34, %v1637_v39  ;;  %v1639_v41 = vpop.f32.mrb[109].mxu0  ;;  %3168 = vmatprep.mubr.bf16.mxu1 %v1766_v38 }
 0x325   :  { %v1640_v42 = vpop.f32.mrb[110].mxu0 }
 0x326   :  { %v3251_v43 = vadd.f32 %v4169_v34, %v1640_v42  ;;  %v1642_v44 = vpop.f32.mrb[111].mxu0  ;;  %v1730_v45 = vmax.f32 %v3250_v40, 0.0 }
 0x328   :  { %v1731_v46 = vmax.f32 %v3251_v43, 0.0 }
 0x32a   :  { %v1767_v47 = vpack.c.bf16 %v1731_v46, %v1730_v45 }
 0x32b   :  { %v1645_v48 = vpop.f32.mrb[112].mxu0 }
 0x32c   :  { %v3252_v49 = vadd.f32 %v4169_v34, %v1645_v48  ;;  %v1647_v50 = vpop.f32.mrb[113].mxu0  ;;  %3169 = vmatmul.mubr.bf16.gmra.mrb[28].mxu1 %v1767_v47 }
 0x32d   :  { %v1648_v51 = vpop.f32.mrb[114].mxu0 }
 0x32e   :  { %v3253_v52 = vadd.f32 %v4169_v34, %v1648_v51  ;;  %v1650_v53 = vpop.f32.mrb[115].mxu0  ;;  %v1732_v54 = vmax.f32 %v3252_v49, 0.0 }
 0x330   :  { %v1733_v55 = vmax.f32 %v3253_v52, 0.0 }
 0x332   :  { %v1768_v56 = vpack.c.bf16 %v1733_v55, %v1732_v54 }
 0x333   :  { %v1653_v57 = vpop.f32.mrb[116].mxu0 }
 0x334   :  { %v3254_v58 = vadd.f32 %v4169_v34, %v1653_v57  ;;  %v1655_v59 = vpop.f32.mrb[117].mxu0  ;;  %3172 = vmatprep.mubr.bf16.mxu1 %v1768_v56 }
 0x335   :  { %v1656_v60 = vpop.f32.mrb[118].mxu0 }
 0x336   :  { %v3255_v61 = vadd.f32 %v4169_v34, %v1656_v60  ;;  %v1658_v62 = vpop.f32.mrb[119].mxu0  ;;  %v1734_v63 = vmax.f32 %v3254_v58, 0.0 }
 0x338   :  { %v1735_v1 = vmax.f32 %v3255_v61, 0.0 }
 0x33a   :  { %v1769_v2 = vpack.c.bf16 %v1735_v1, %v1734_v63 }
 0x33b   :  { %v1661_v3 = vpop.f32.mrb[120].mxu0 }
 0x33c   :  { %v3256_v4 = vadd.f32 %v4169_v34, %v1661_v3  ;;  %v1663_v5 = vpop.f32.mrb[121].mxu0  ;;  %3173 = vmatmul.mubr.bf16.gmra.mrb[32].mxu1 %v1769_v2 }
 0x33d   :  { %v1664_v6 = vpop.f32.mrb[122].mxu0 }
 0x33e   :  { %v3257_v7 = vadd.f32 %v4169_v34, %v1664_v6  ;;  %v1666_v8 = vpop.f32.mrb[123].mxu0  ;;  %v1736_v9 = vmax.f32 %v3256_v4, 0.0 }
 0x33f   :  { %v3825_v8 = vld [vmem:[#allocation3 + $0x24] ss:$16 sps:$4 sm:$0xff]  }
 0x340   :  { %v1737_v10 = vmax.f32 %v3257_v7, 0.0  ;;  %v3824_v7 = vld [vmem:[#allocation3] ss:$16 sps:$4 sm:$0xff]  }
 0x342   :  { %v1770_v11 = vpack.c.bf16 %v1737_v10, %v1736_v9 }
 0x343   :  { %v1669_v12 = vpop.f32.mrb[124].mxu0 }
 0x344   :  { %v3258_v13 = vadd.f32 %v4169_v34, %v1669_v12  ;;  %v1671_v14 = vpop.f32.mrb[125].mxu0  ;;  %3176 = vmatprep.mubr.bf16.mxu1 %v1770_v11 }
 0x345   :  { %v1672_v15 = vpop.f32.mrb[126].mxu0 }
 0x346   :  { %v3259_v16 = vadd.f32 %v4169_v34, %v1672_v15  ;;  %v1674_v17 = vpop.f32.mrb[127].mxu0  ;;  %v1738_v18 = vmax.f32 %v3258_v13, 0.0  ;;  %v3826_v15 = vld [vmem:[#allocation3 + $0x20] ss:$16 sps:$4 sm:$0xff]  }
 0x347   :  { %v3828_v17 = vld [vmem:[#allocation3 + $0x40] ss:$16 sps:$4 sm:$0xff]  }
 0x348   :  { %v1739_v19 = vmax.f32 %v3259_v16, 0.0  ;;  %v3827_v16 = vld [vmem:[#allocation3 + $0x44] ss:$16 sps:$4 sm:$0xff]  }
 0x34a   :  { %v1771_v20 = vpack.c.bf16 %v1739_v19, %v1738_v18  ;;  %v3829_v18 = vld [vmem:[#allocation3 + $0x64] ss:$16 sps:$4 sm:$0xff]  }
 0x34b   :  { %v3118_v21 = vpop.f32.mrb[128].mxu0 }
 0x34c   :  { %v1870_v22 = vpop.f32.mrb[129].mxu0  ;;  %3177 = vmatmul.mubr.bf16.gmra.mrb[36].mxu1 %v1771_v20 }
 0x34d   :  { %v3119_v23 = vpop.f32.mrb[130].mxu0  ;;  %2196 = vmatprep.mubr.bf16.mxu1 %v3823_v24 }
 0x34e   :  { %v2126_v25 = vpack.c.bf16 %v3119_v23, %v3118_v21  ;;  %v1873_v26 = vpop.f32.mrb[131].mxu0 }
 0x34f   :  { %v2125_v27 = vpack.c.bf16 %v1873_v26, %v1870_v22  ;;  %v3831_v26 = vld [vmem:[#allocation3 + $0x84] ss:$16 sps:$4 sm:$0xff]  }
 0x351   :  { %2165 = vmatpush1.bf16.msra.mxu1 %v2125_v27  ;;  %v3832_v27 = vld [vmem:[#allocation3 + $0x80] ss:$16 sps:$4 sm:$0xff]  }
 0x352   :  { %2166 = vmatprep.subr.bf16.mxu1 %v4052_v0 }
 0x353   :  { %v3122_v28 = vpop.f32.mrb[132].mxu0 }
 0x354   :  { %v1886_v29 = vpop.f32.mrb[133].mxu0 }
 0x355   :  { %v3123_v30 = vpop.f32.mrb[134].mxu0  ;;  %2167 = vmatpush1.bf16.msra.mxu1 %v2126_v25  ;;  %v3830_v25 = vld [vmem:[#allocation3 + $0x60] ss:$16 sps:$4 sm:$0xff]  }
 0x356   :  { %v2128_v34 = vpack.c.bf16 %v3123_v30, %v3122_v28  ;;  %v1889_v31 = vpop.f32.mrb[135].mxu0  ;;  %2168 = vmatprep.subr.bf16.mxu1 %v4052_v0  ;;  %v3833_v28 = vld [vmem:[#allocation3 + $0xa4] ss:$16 sps:$4 sm:$0xff]  }
 0x357   :  { %v2127_v32 = vpack.c.bf16 %v1889_v31, %v1886_v29 }
 0x359   :  { %2169 = vmatpush1.bf16.msra.mxu1 %v2127_v32 }
 0x35a   :  { %2170 = vmatprep.subr.bf16.mxu1 %v4052_v0 }
 0x35b   :  { %v3126_v33 = vpop.f32.mrb[136].mxu0 }
 0x35c   :  { %v1902_v35 = vpop.f32.mrb[137].mxu0 }
 0x35d   :  { %v3127_v36 = vpop.f32.mrb[138].mxu0  ;;  %2171 = vmatpush1.bf16.msra.mxu1 %v2128_v34 }
 0x35e   :  { %v2130_v37 = vpack.c.bf16 %v3127_v36, %v3126_v33  ;;  %v1905_v38 = vpop.f32.mrb[139].mxu0  ;;  %2172 = vmatprep.subr.bf16.mxu1 %v4052_v0  ;;  %v3835_v36 = vld [vmem:[#allocation3 + $0xc4] ss:$16 sps:$4 sm:$0xff]  }
 0x35f   :  { %v2129_v39 = vpack.c.bf16 %v1905_v38, %v1902_v35  ;;  %v3834_v35 = vld [vmem:[#allocation3 + $0xa0] ss:$16 sps:$4 sm:$0xff]   ;;  %v3837_v38 = vld [vmem:[#allocation3 + $0xe4] ss:$16 sps:$4 sm:$0xff]  }
 0x361   :  { %2173 = vmatpush1.bf16.msra.mxu1 %v2129_v39 }
 0x362   :  { %2174 = vmatprep.subr.bf16.mxu1 %v4052_v0 }
 0x363   :  { %v3130_v40 = vpop.f32.mrb[140].mxu0 }
 0x364   :  { %v1918_v41 = vpop.f32.mrb[141].mxu0 }
 0x365   :  { %v3131_v42 = vpop.f32.mrb[142].mxu0  ;;  %2175 = vmatpush1.bf16.msra.mxu1 %v2130_v37  ;;  %v3836_v37 = vld [vmem:[#allocation3 + $0xc0] ss:$16 sps:$4 sm:$0xff]  }
 0x366   :  { %v2132_v43 = vpack.c.bf16 %v3131_v42, %v3130_v40  ;;  %v1921_v44 = vpop.f32.mrb[143].mxu0  ;;  %2176 = vmatprep.subr.bf16.mxu1 %v4052_v0 }
 0x367   :  { %v2131_v45 = vpack.c.bf16 %v1921_v44, %v1918_v41 }
 0x369   :  { %2177 = vmatpush1.bf16.msra.mxu1 %v2131_v45  ;;  %v3838_v45 = vld [vmem:[#allocation3 + $0xe0] ss:$16 sps:$4 sm:$0xff]  }
 0x36a   :  { %2178 = vmatprep.subr.bf16.mxu1 %v4052_v0 }
 0x36d   :  { %2179 = vmatpush1.bf16.msra.mxu1 %v2132_v43 }
 0x36e   :  { %2180 = vmatprep.subr.bf16.mxu1 %v4052_v0 }
 0x36f   :  { %v3134_v46 = vpop.f32.mrb[144].mxu0 }
 0x370   :  { %v1934_v47 = vpop.f32.mrb[145].mxu0 }
 0x371   :  { %v3135_v48 = vpop.f32.mrb[146].mxu0 }
 0x372   :  { %v2134_v49 = vpack.c.bf16 %v3135_v48, %v3134_v46  ;;  %v1937_v50 = vpop.f32.mrb[147].mxu0  ;;  %v3839_v46 = vld [vmem:[#allocation3 + $0x104] ss:$16 sps:$4 sm:$0xff]  }
 0x373   :  { %v2133_v51 = vpack.c.bf16 %v1937_v50, %v1934_v47  ;;  %v3840_v47 = vld [vmem:[#allocation3 + $0x100] ss:$16 sps:$4 sm:$0xff]   ;;  %v3841_v48 = vld [vmem:[#allocation3 + $0x124] ss:$16 sps:$4 sm:$0xff]  }
 0x375   :  { %2181 = vmatpush1.bf16.msra.mxu1 %v2133_v51 }
 0x376   :  { %2182 = vmatprep.subr.bf16.mxu1 %v4052_v0 }
 0x379   :  { %2183 = vmatpush1.bf16.msra.mxu1 %v2134_v49 }
 0x37a   :  { %2184 = vmatprep.subr.bf16.mxu1 %v4052_v0 }
 0x37f   :  { %v3138_v52 = vpop.f32.mrb[148].mxu0 }
 0x380   :  { %v1950_v53 = vpop.f32.mrb[149].mxu0 }
 0x381   :  { %v3139_v54 = vpop.f32.mrb[150].mxu0 }
 0x382   :  { %v2136_v55 = vpack.c.bf16 %v3139_v54, %v3138_v52  ;;  %v1953_v56 = vpop.f32.mrb[151].mxu0 }
 0x383   :  { %v2135_v57 = vpack.c.bf16 %v1953_v56, %v1950_v53  ;;  %v3843_v56 = vld [vmem:[#allocation3 + $0x144] ss:$16 sps:$4 sm:$0xff]  }
 0x385   :  { %2185 = vmatpush1.bf16.msra.mxu1 %v2135_v57  ;;  %v3844_v57 = vld [vmem:[#allocation3 + $0x140] ss:$16 sps:$4 sm:$0xff]  }
 0x386   :  { %2186 = vmatprep.subr.bf16.mxu1 %v4052_v0 }
 0x389   :  { %2187 = vmatpush1.bf16.msra.mxu1 %v2136_v55  ;;  %v3842_v55 = vld [vmem:[#allocation3 + $0x120] ss:$16 sps:$4 sm:$0xff]  }
 0x38a   :  { %2188 = vmatprep.subr.bf16.mxu1 %v4052_v0 }
 0x38f   :  { %v3142_v58 = vpop.f32.mrb[0].mxu1 }
 0x390   :  { %v1966_v59 = vpop.f32.mrb[1].mxu1 }
 0x391   :  { %v3143_v60 = vpop.f32.mrb[2].mxu1 }
 0x392   :  { %v2138_v61 = vpack.c.bf16 %v3143_v60, %v3142_v58  ;;  %v1969_v62 = vpop.f32.mrb[3].mxu1  ;;  %v3845_v58 = vld [vmem:[#allocation3 + $0x164] ss:$16 sps:$4 sm:$0xff]  }
 0x393   :  { %v2137_v63 = vpack.c.bf16 %v1969_v62, %v1966_v59 }
 0x395   :  { %2189 = vmatpush1.bf16.msra.mxu1 %v2137_v63 }
 0x396   :  { %2190 = vmatprep.subr.bf16.mxu1 %v4052_v0 }
 0x399   :  { %2191 = vmatpush1.bf16.msra.mxu1 %v2138_v61 }
 0x39a   :  { %2192 = vmatprep.subr.bf16.mxu1 %v4052_v0 }
 0x39f   :  { %v3146_v1 = vpop.f32.mrb[4].mxu1 }
 0x3a0   :  { %v1982_v2 = vpop.f32.mrb[5].mxu1 }
 0x3a1   :  { %v3147_v3 = vpop.f32.mrb[6].mxu1 }
 0x3a2   :  { %v2140_v4 = vpack.c.bf16 %v3147_v3, %v3146_v1  ;;  %v1985_v5 = vpop.f32.mrb[7].mxu1  ;;  %v3847_v3 = vld [vmem:[#allocation3 + $0x184] ss:$16 sps:$4 sm:$0xff]  }
 0x3a3   :  { %v2139_v6 = vpack.c.bf16 %v1985_v5, %v1982_v2  ;;  %v3846_v2 = vld [vmem:[#allocation3 + $0x160] ss:$16 sps:$4 sm:$0xff]   ;;  %v3849_v5 = vld [vmem:[#allocation3 + $0x1a4] ss:$16 sps:$4 sm:$0xff]  }
 0x3a5   :  { %2193 = vmatpush1.bf16.msra.mxu1 %v2139_v6 }
 0x3a6   :  { %2194 = vmatprep.subr.bf16.mxu1 %v4052_v0 }
 0x3a9   :  { %2195 = vmatpush1.bf16.msra.mxu1 %v2140_v4  ;;  %v3848_v4 = vld [vmem:[#allocation3 + $0x180] ss:$16 sps:$4 sm:$0xff]  }
 0x3aa   :  { %2453 = vmatprep.subr.bf16.mxu1 %v4052_v0 }
 0x3ac   :  { %2197 = vmatmul.mubr.bf16.vlgmr.msra.gmra.mrb[40].mxu1 %v3824_v7 }
 0x3ad   :  { %2204 = vmatprep.mubr.bf16.mxu1 %v3825_v8 }
 0x3af   :  { %v3150_v9 = vpop.f32.mrb[8].mxu1 }
 0x3b0   :  { %v1998_v10 = vpop.f32.mrb[9].mxu1 }
 0x3b1   :  { %v3151_v11 = vpop.f32.mrb[10].mxu1 }
 0x3b2   :  { %v2142_v12 = vpack.c.bf16 %v3151_v11, %v3150_v9  ;;  %v2001_v13 = vpop.f32.mrb[11].mxu1 }
 0x3b3   :  { %v2141_v14 = vpack.c.bf16 %v2001_v13, %v1998_v10  ;;  %v3851_v13 = vld [vmem:[#allocation3 + $0x1c4] ss:$16 sps:$4 sm:$0xff]  }
 0x3b4   :  { %2205 = vmatmul.mubr.bf16.gmra.mrb[44].mxu1 %v3826_v15  ;;  %v3853_v15 = vld [vmem:[#allocation3 + $0x1e4] ss:$16 sps:$4 sm:$0xff]  }
 0x3b5   :  { %2454 = vmatpush1.bf16.msra.mxu1 %v2141_v14  ;;  %2212 = vmatprep.mubr.bf16.mxu1 %v3827_v16  ;;  %v3852_v14 = vld [vmem:[#allocation3 + $0x1c0] ss:$16 sps:$4 sm:$0xff]  }
 0x3b6   :  { %2455 = vmatprep.subr.bf16.mxu1 %v4052_v0 }
 0x3b9   :  { %2456 = vmatpush1.bf16.msra.mxu1 %v2142_v12  ;;  %v3850_v12 = vld [vmem:[#allocation3 + $0x1a0] ss:$16 sps:$4 sm:$0xff]  }
 0x3ba   :  { %2457 = vmatprep.subr.bf16.mxu1 %v4052_v0 }
 0x3bc   :  { %2213 = vmatmul.mubr.bf16.gmra.mrb[48].mxu1 %v3828_v17 }
 0x3bd   :  { %2220 = vmatprep.mubr.bf16.mxu1 %v3829_v18 }
 0x3bf   :  { %v3154_v19 = vpop.f32.mrb[12].mxu1 }
 0x3c0   :  { %v2014_v20 = vpop.f32.mrb[13].mxu1 }
 0x3c1   :  { %v3155_v21 = vpop.f32.mrb[14].mxu1 }
 0x3c2   :  { %v2144_v22 = vpack.c.bf16 %v3155_v21, %v3154_v19  ;;  %v2017_v23 = vpop.f32.mrb[15].mxu1 }
 0x3c3   :  { %v2143_v24 = vpack.c.bf16 %v2017_v23, %v2014_v20  ;;  %v3855_v23 = vld [vmem:[#allocation3 + $0x204] ss:$16 sps:$4 sm:$0xff]  }
 0x3c4   :  { %2221 = vmatmul.mubr.bf16.gmra.mrb[52].mxu1 %v3830_v25  ;;  %v3857_v25 = vld [vmem:[#allocation3 + $0x224] ss:$16 sps:$4 sm:$0xff]  }
 0x3c5   :  { %2458 = vmatpush1.bf16.msra.mxu1 %v2143_v24  ;;  %2228 = vmatprep.mubr.bf16.mxu1 %v3831_v26  ;;  %v3856_v24 = vld [vmem:[#allocation3 + $0x200] ss:$16 sps:$4 sm:$0xff]  }
 0x3c6   :  { %2459 = vmatprep.subr.bf16.mxu1 %v4052_v0  ;;  %v3858_v26 = vld [vmem:[#allocation3 + $0x220] ss:$16 sps:$4 sm:$0xff]  }
 0x3c9   :  { %2460 = vmatpush1.bf16.msra.mxu1 %v2144_v22  ;;  %v3854_v22 = vld [vmem:[#allocation3 + $0x1e0] ss:$16 sps:$4 sm:$0xff]  }
 0x3ca   :  { %2461 = vmatprep.subr.bf16.mxu1 %v4052_v0 }
 0x3cc   :  { %2229 = vmatmul.mubr.bf16.gmra.mrb[56].mxu1 %v3832_v27  ;;  %v3859_v27 = vld [vmem:[#allocation3 + $0x244] ss:$16 sps:$4 sm:$0xff]  }
 0x3cd   :  { %2236 = vmatprep.mubr.bf16.mxu1 %v3833_v28  ;;  %v3860_v28 = vld [vmem:[#allocation3 + $0x240] ss:$16 sps:$4 sm:$0xff]  }
 0x3cf   :  { %v3158_v29 = vpop.f32.mrb[16].mxu1 }
 0x3d0   :  { %v2030_v30 = vpop.f32.mrb[17].mxu1 }
 0x3d1   :  { %v3159_v34 = vpop.f32.mrb[18].mxu1 }
 0x3d2   :  { %v2146_v31 = vpack.c.bf16 %v3159_v34, %v3158_v29  ;;  %v2033_v32 = vpop.f32.mrb[19].mxu1  ;;  %v3861_v29 = vld [vmem:[#allocation3 + $0x264] ss:$16 sps:$4 sm:$0xff]  }
 0x3d3   :  { %v2145_v33 = vpack.c.bf16 %v2033_v32, %v2030_v30  ;;  %v3862_v30 = vld [vmem:[#allocation3 + $0x260] ss:$16 sps:$4 sm:$0xff]   ;;  %v3863_v34 = vld [vmem:[#allocation3 + $0x284] ss:$16 sps:$4 sm:$0xff]  }
 0x3d4   :  { %2237 = vmatmul.mubr.bf16.gmra.mrb[60].mxu1 %v3834_v35  ;;  %v3866_v32 = vld [vmem:[#allocation3 + $0x2a0] ss:$16 sps:$4 sm:$0xff]  }
 0x3d5   :  { %2462 = vmatpush1.bf16.msra.mxu1 %v2145_v33  ;;  %2244 = vmatprep.mubr.bf16.mxu1 %v3835_v36  ;;  %v3867_v33 = vld [vmem:[#allocation3 + $0x2c4] ss:$16 sps:$4 sm:$0xff]   ;;  %v3868_v35 = vld [vmem:[#allocation3 + $0x2c0] ss:$16 sps:$4 sm:$0xff]  }
 0x3d6   :  { %2463 = vmatprep.subr.bf16.mxu1 %v4052_v0  ;;  %v3869_v36 = vld [vmem:[#allocation3 + $0x2e4] ss:$16 sps:$4 sm:$0xff]  }
 0x3d9   :  { %2464 = vmatpush1.bf16.msra.mxu1 %v2146_v31  ;;  %v3864_v31 = vld [vmem:[#allocation3 + $0x280] ss:$16 sps:$4 sm:$0xff]  }
 0x3da   :  { %2465 = vmatprep.subr.bf16.mxu1 %v4052_v0 }
 0x3dc   :  { %2245 = vmatmul.mubr.bf16.gmra.mrb[64].mxu1 %v3836_v37  ;;  %v3870_v37 = vld [vmem:[#allocation3 + $0x2e0] ss:$16 sps:$4 sm:$0xff]  }
 0x3dd   :  { %2252 = vmatprep.mubr.bf16.mxu1 %v3837_v38  ;;  %v3871_v38 = vld [vmem:[#allocation3 + $0x304] ss:$16 sps:$4 sm:$0xff]  }
 0x3df   :  { %v3162_v39 = vpop.f32.mrb[20].mxu1 }
 0x3e0   :  { %v2046_v40 = vpop.f32.mrb[21].mxu1 }
 0x3e1   :  { %v3163_v41 = vpop.f32.mrb[22].mxu1 }
 0x3e2   :  { %v2148_v42 = vpack.c.bf16 %v3163_v41, %v3162_v39  ;;  %v2049_v43 = vpop.f32.mrb[23].mxu1  ;;  %v3872_v39 = vld [vmem:[#allocation3 + $0x300] ss:$16 sps:$4 sm:$0xff]  }
 0x3e3   :  { %v2147_v44 = vpack.c.bf16 %v2049_v43, %v2046_v40  ;;  %v3873_v40 = vld [vmem:[#allocation3 + $0x324] ss:$16 sps:$4 sm:$0xff]   ;;  %v3874_v41 = vld [vmem:[#allocation3 + $0x320] ss:$16 sps:$4 sm:$0xff]  }
 0x3e4   :  { %2253 = vmatmul.mubr.bf16.gmra.mrb[68].mxu1 %v3838_v45  ;;  %v3876_v43 = vld [vmem:[#allocation3 + $0x340] ss:$16 sps:$4 sm:$0xff]  }
 0x3e5   :  { %2466 = vmatpush1.bf16.msra.mxu1 %v2147_v44  ;;  %2260 = vmatprep.mubr.bf16.mxu1 %v3839_v46  ;;  %v3877_v44 = vld [vmem:[#allocation3 + $0x364] ss:$16 sps:$4 sm:$0xff]   ;;  %v3878_v45 = vld [vmem:[#allocation3 + $0x360] ss:$16 sps:$4 sm:$0xff]  }
 0x3e6   :  { %2467 = vmatprep.subr.bf16.mxu1 %v4052_v0  ;;  %v3879_v46 = vld [vmem:[#allocation3 + $0x384] ss:$16 sps:$4 sm:$0xff]  }
 0x3e9   :  { %2468 = vmatpush1.bf16.msra.mxu1 %v2148_v42  ;;  %v3875_v42 = vld [vmem:[#allocation3 + $0x344] ss:$16 sps:$4 sm:$0xff]  }
 0x3ea   :  { %2469 = vmatprep.subr.bf16.mxu1 %v4052_v0 }
 0x3ec   :  { %2261 = vmatmul.mubr.bf16.gmra.mrb[72].mxu1 %v3840_v47  ;;  %v3880_v47 = vld [vmem:[#allocation3 + $0x380] ss:$16 sps:$4 sm:$0xff]  }
 0x3ed   :  { %2268 = vmatprep.mubr.bf16.mxu1 %v3841_v48  ;;  %v3881_v48 = vld [vmem:[#allocation3 + $0x3a4] ss:$16 sps:$4 sm:$0xff]  }
 0x3ef   :  { %v3166_v49 = vpop.f32.mrb[24].mxu1 }
 0x3f0   :  { %v2062_v50 = vpop.f32.mrb[25].mxu1 }
 0x3f1   :  { %v3167_v51 = vpop.f32.mrb[26].mxu1 }
 0x3f2   :  { %v2150_v52 = vpack.c.bf16 %v3167_v51, %v3166_v49  ;;  %v2065_v53 = vpop.f32.mrb[27].mxu1  ;;  %v3882_v49 = vld [vmem:[#allocation3 + $0x3a0] ss:$16 sps:$4 sm:$0xff]  }
 0x3f3   :  { %v2149_v54 = vpack.c.bf16 %v2065_v53, %v2062_v50  ;;  %v3883_v50 = vld [vmem:[#allocation3 + $0x3c4] ss:$16 sps:$4 sm:$0xff]   ;;  %v3884_v51 = vld [vmem:[#allocation3 + $0x3c0] ss:$16 sps:$4 sm:$0xff]  }
 0x3f4   :  { %2269 = vmatmul.mubr.bf16.gmra.mrb[76].mxu1 %v3842_v55  ;;  %v3886_v53 = vld [vmem:[#allocation3 + $0x3e0] ss:$16 sps:$4 sm:$0xff]   ;;  %v3888_v55 = vld [vmem:[#allocation3 + $0x8] ss:$16 sps:$4 sm:$0xff]  }
 0x3f5   :  { %2470 = vmatpush1.bf16.msra.mxu1 %v2149_v54  ;;  %2276 = vmatprep.mubr.bf16.mxu1 %v3843_v56  ;;  %v3887_v54 = vld [vmem:[#allocation3 + $0xc] ss:$16 sps:$4 sm:$0xff]  }
 0x3f6   :  { %2471 = vmatprep.subr.bf16.mxu1 %v4052_v0  ;;  %v3889_v56 = vld [vmem:[#allocation3 + $0x2c] ss:$16 sps:$4 sm:$0xff]  }
 0x3f9   :  { %2472 = vmatpush1.bf16.msra.mxu1 %v2150_v52  ;;  %v3885_v52 = vld [vmem:[#allocation3 + $0x3e4] ss:$16 sps:$4 sm:$0xff]  }
 0x3fa   :  { %2473 = vmatprep.subr.bf16.mxu1 %v4052_v0 }
 0x3fc   :  { %2277 = vmatmul.mubr.bf16.gmra.mrb[80].mxu1 %v3844_v57  ;;  %v3890_v57 = vld [vmem:[#allocation3 + $0x28] ss:$16 sps:$4 sm:$0xff]  }
 0x3fd   :  { %2284 = vmatprep.mubr.bf16.mxu1 %v3845_v58  ;;  %v3891_v58 = vld [vmem:[#allocation3 + $0x4c] ss:$16 sps:$4 sm:$0xff]  }
 0x3ff   :  { %v3170_v59 = vpop.f32.mrb[28].mxu1 }
 0x400   :  { %v2078_v60 = vpop.f32.mrb[29].mxu1 }
 0x401   :  { %v3171_v61 = vpop.f32.mrb[30].mxu1 }
 0x402   :  { %v2152_v62 = vpack.c.bf16 %v3171_v61, %v3170_v59  ;;  %v2081_v63 = vpop.f32.mrb[31].mxu1  ;;  %v3892_v59 = vld [vmem:[#allocation3 + $0x48] ss:$16 sps:$4 sm:$0xff]  }
 0x403   :  { %v2151_v1 = vpack.c.bf16 %v2081_v63, %v2078_v60  ;;  %v3893_v60 = vld [vmem:[#allocation3 + $0x6c] ss:$16 sps:$4 sm:$0xff]   ;;  %v3894_v61 = vld [vmem:[#allocation3 + $0x68] ss:$16 sps:$4 sm:$0xff]  }
 0x404   :  { %2285 = vmatmul.mubr.bf16.gmra.mrb[84].mxu1 %v3846_v2  ;;  %v3896_v63 = vld [vmem:[#allocation3 + $0x88] ss:$16 sps:$4 sm:$0xff]  }
 0x405   :  { %2474 = vmatpush1.bf16.msra.mxu1 %v2151_v1  ;;  %2292 = vmatprep.mubr.bf16.mxu1 %v3847_v3  ;;  %v3897_v1 = vld [vmem:[#allocation3 + $0xac] ss:$16 sps:$4 sm:$0xff]   ;;  %v3898_v2 = vld [vmem:[#allocation3 + $0xa8] ss:$16 sps:$4 sm:$0xff]  }
 0x406   :  { %2475 = vmatprep.subr.bf16.mxu1 %v4052_v0  ;;  %v3899_v3 = vld [vmem:[#allocation3 + $0xcc] ss:$16 sps:$4 sm:$0xff]  }
 0x409   :  { %2476 = vmatpush1.bf16.msra.mxu1 %v2152_v62  ;;  %v3895_v62 = vld [vmem:[#allocation3 + $0x8c] ss:$16 sps:$4 sm:$0xff]  }
 0x40a   :  { %2477 = vmatprep.subr.bf16.mxu1 %v4052_v0 }
 0x40c   :  { %2293 = vmatmul.mubr.bf16.gmra.mrb[88].mxu1 %v3848_v4  ;;  %v3900_v4 = vld [vmem:[#allocation3 + $0xc8] ss:$16 sps:$4 sm:$0xff]  }
 0x40d   :  { %2300 = vmatprep.mubr.bf16.mxu1 %v3849_v5  ;;  %v3901_v5 = vld [vmem:[#allocation3 + $0xec] ss:$16 sps:$4 sm:$0xff]  }
 0x40f   :  { %v3174_v6 = vpop.f32.mrb[32].mxu1 }
 0x410   :  { %v2094_v7 = vpop.f32.mrb[33].mxu1 }
 0x411   :  { %v3175_v8 = vpop.f32.mrb[34].mxu1 }
 0x412   :  { %v2154_v9 = vpack.c.bf16 %v3175_v8, %v3174_v6  ;;  %v2097_v10 = vpop.f32.mrb[35].mxu1  ;;  %v3902_v6 = vld [vmem:[#allocation3 + $0xe8] ss:$16 sps:$4 sm:$0xff]  }
 0x413   :  { %v2153_v11 = vpack.c.bf16 %v2097_v10, %v2094_v7  ;;  %v3903_v7 = vld [vmem:[#allocation3 + $0x10c] ss:$16 sps:$4 sm:$0xff]   ;;  %v3904_v8 = vld [vmem:[#allocation3 + $0x108] ss:$16 sps:$4 sm:$0xff]  }
 0x414   :  { %2301 = vmatmul.mubr.bf16.gmra.mrb[92].mxu1 %v3850_v12  ;;  %v3906_v10 = vld [vmem:[#allocation3 + $0x128] ss:$16 sps:$4 sm:$0xff]  }
 0x415   :  { %2478 = vmatpush1.bf16.msra.mxu1 %v2153_v11  ;;  %2308 = vmatprep.mubr.bf16.mxu1 %v3851_v13  ;;  %v3907_v11 = vld [vmem:[#allocation3 + $0x14c] ss:$16 sps:$4 sm:$0xff]   ;;  %v3908_v12 = vld [vmem:[#allocation3 + $0x148] ss:$16 sps:$4 sm:$0xff]  }
 0x416   :  { %2479 = vmatprep.subr.bf16.mxu1 %v4052_v0  ;;  %v3909_v13 = vld [vmem:[#allocation3 + $0x16c] ss:$16 sps:$4 sm:$0xff]  }
 0x419   :  { %2480 = vmatpush1.bf16.msra.mxu1 %v2154_v9  ;;  %v3905_v9 = vld [vmem:[#allocation3 + $0x12c] ss:$16 sps:$4 sm:$0xff]  }
 0x41a   :  { %2481 = vmatprep.subr.bf16.mxu1 %v4052_v0 }
 0x41c   :  { %2309 = vmatmul.mubr.bf16.gmra.mrb[96].mxu1 %v3852_v14  ;;  %v3910_v14 = vld [vmem:[#allocation3 + $0x168] ss:$16 sps:$4 sm:$0xff]  }
 0x41d   :  { %2316 = vmatprep.mubr.bf16.mxu1 %v3853_v15  ;;  %v3911_v15 = vld [vmem:[#allocation3 + $0x18c] ss:$16 sps:$4 sm:$0xff]  }
 0x41f   :  { %v3178_v16 = vpop.f32.mrb[36].mxu1 }
 0x420   :  { %v2110_v17 = vpop.f32.mrb[37].mxu1 }
 0x421   :  { %v3179_v18 = vpop.f32.mrb[38].mxu1 }
 0x422   :  { %v2156_v19 = vpack.c.bf16 %v3179_v18, %v3178_v16  ;;  %v2113_v20 = vpop.f32.mrb[39].mxu1  ;;  %v3912_v16 = vld [vmem:[#allocation3 + $0x188] ss:$16 sps:$4 sm:$0xff]  }
 0x423   :  { %v2155_v21 = vpack.c.bf16 %v2113_v20, %v2110_v17  ;;  %v3913_v17 = vld [vmem:[#allocation3 + $0x1ac] ss:$16 sps:$4 sm:$0xff]   ;;  %v3914_v18 = vld [vmem:[#allocation3 + $0x1a8] ss:$16 sps:$4 sm:$0xff]  }
 0x424   :  { %2317 = vmatmul.mubr.bf16.gmra.mrb[100].mxu1 %v3854_v22  ;;  %v3916_v20 = vld [vmem:[#allocation3 + $0x1c8] ss:$16 sps:$4 sm:$0xff]  }
 0x425   :  { %2482 = vmatpush1.bf16.msra.mxu1 %v2155_v21  ;;  %2324 = vmatprep.mubr.bf16.mxu1 %v3855_v23  ;;  %v3917_v21 = vld [vmem:[#allocation3 + $0x1ec] ss:$16 sps:$4 sm:$0xff]   ;;  %v3918_v22 = vld [vmem:[#allocation3 + $0x1e8] ss:$16 sps:$4 sm:$0xff]  }
 0x426   :  { %2483 = vmatprep.subr.bf16.mxu1 %v4052_v0  ;;  %v3865_v0 = vld [vmem:[#allocation3 + $0x2a4] ss:$16 sps:$4 sm:$0xff]   ;;  %v3919_v23 = vld [vmem:[#allocation3 + $0x20c] ss:$16 sps:$4 sm:$0xff]  }
 0x429   :  { %2484 = vmatpush1.bf16.msra.mxu1 %v2156_v19  ;;  %v3915_v19 = vld [vmem:[#allocation3 + $0x1cc] ss:$16 sps:$4 sm:$0xff]  }
 0x42c   :  { %2325 = vmatmul.mubr.bf16.gmra.mrb[104].mxu1 %v3856_v24  ;;  %v3920_v24 = vld [vmem:[#allocation3 + $0x208] ss:$16 sps:$4 sm:$0xff]  }
 0x42d   :  { %2332 = vmatprep.mubr.bf16.mxu1 %v3857_v25  ;;  %v3921_v25 = vld [vmem:[#allocation3 + $0x22c] ss:$16 sps:$4 sm:$0xff]  }
 0x434   :  { %2333 = vmatmul.mubr.bf16.gmra.mrb[108].mxu1 %v3858_v26  ;;  %v3922_v26 = vld [vmem:[#allocation3 + $0x228] ss:$16 sps:$4 sm:$0xff]  }
 0x435   :  { %2340 = vmatprep.mubr.bf16.mxu1 %v3859_v27  ;;  %v3923_v27 = vld [vmem:[#allocation3 + $0x24c] ss:$16 sps:$4 sm:$0xff]  }
 0x43c   :  { %2341 = vmatmul.mubr.bf16.gmra.mrb[112].mxu1 %v3860_v28  ;;  %v3924_v28 = vld [vmem:[#allocation3 + $0x248] ss:$16 sps:$4 sm:$0xff]  }
 0x43d   :  { %2348 = vmatprep.mubr.bf16.mxu1 %v3861_v29  ;;  %v3925_v29 = vld [vmem:[#allocation3 + $0x26c] ss:$16 sps:$4 sm:$0xff]  }
 0x444   :  { %2349 = vmatmul.mubr.bf16.gmra.mrb[116].mxu1 %v3862_v30  ;;  %v3926_v30 = vld [vmem:[#allocation3 + $0x268] ss:$16 sps:$4 sm:$0xff]  }
 0x445   :  { %2356 = vmatprep.mubr.bf16.mxu1 %v3863_v34  ;;  %v3927_v34 = vld [vmem:[#allocation3 + $0x28c] ss:$16 sps:$4 sm:$0xff]  }
 0x44c   :  { %2357 = vmatmul.mubr.bf16.gmra.mrb[120].mxu1 %v3864_v31  ;;  %v3928_v31 = vld [vmem:[#allocation3 + $0x288] ss:$16 sps:$4 sm:$0xff]  }
 0x44d   :  { %2364 = vmatprep.mubr.bf16.mxu1 %v3865_v0  ;;  %v3929_v0 = vld [vmem:[#allocation3 + $0x2ac] ss:$16 sps:$4 sm:$0xff]  }
 0x454   :  { %2365 = vmatmul.mubr.bf16.gmra.mrb[124].mxu1 %v3866_v32  ;;  %v3930_v32 = vld [vmem:[#allocation3 + $0x2a8] ss:$16 sps:$4 sm:$0xff]  }
 0x455   :  { %2372 = vmatprep.mubr.bf16.mxu1 %v3867_v33  ;;  %v3931_v33 = vld [vmem:[#allocation3 + $0x2cc] ss:$16 sps:$4 sm:$0xff]  }
 0x45c   :  { %2373 = vmatmul.mubr.bf16.gmra.mrb[128].mxu1 %v3868_v35  ;;  %v3932_v35 = vld [vmem:[#allocation3 + $0x2c8] ss:$16 sps:$4 sm:$0xff]  }
 0x45d   :  { %2380 = vmatprep.mubr.bf16.mxu1 %v3869_v36  ;;  %v3933_v36 = vld [vmem:[#allocation3 + $0x2ec] ss:$16 sps:$4 sm:$0xff]  }
 0x464   :  { %2381 = vmatmul.mubr.bf16.gmra.mrb[132].mxu1 %v3870_v37  ;;  %v3934_v37 = vld [vmem:[#allocation3 + $0x2e8] ss:$16 sps:$4 sm:$0xff]  }
 0x465   :  { %2388 = vmatprep.mubr.bf16.mxu1 %v3871_v38  ;;  %v3935_v38 = vld [vmem:[#allocation3 + $0x30c] ss:$16 sps:$4 sm:$0xff]  }
 0x46c   :  { %2389 = vmatmul.mubr.bf16.gmra.mrb[136].mxu1 %v3872_v39  ;;  %v3936_v39 = vld [vmem:[#allocation3 + $0x308] ss:$16 sps:$4 sm:$0xff]  }
 0x46d   :  { %2396 = vmatprep.mubr.bf16.mxu1 %v3873_v40  ;;  %v3937_v40 = vld [vmem:[#allocation3 + $0x32c] ss:$16 sps:$4 sm:$0xff]  }
 0x474   :  { %2397 = vmatmul.mubr.bf16.gmra.mrb[140].mxu1 %v3874_v41  ;;  %v3938_v41 = vld [vmem:[#allocation3 + $0x328] ss:$16 sps:$4 sm:$0xff]  }
 0x475   :  { %2404 = vmatprep.mubr.bf16.mxu1 %v3875_v42  ;;  %v3939_v42 = vld [vmem:[#allocation3 + $0x34c] ss:$16 sps:$4 sm:$0xff]  }
 0x47c   :  { %2405 = vmatmul.mubr.bf16.gmra.mrb[144].mxu1 %v3876_v43  ;;  %v3940_v43 = vld [vmem:[#allocation3 + $0x348] ss:$16 sps:$4 sm:$0xff]  }
 0x47d   :  { %2412 = vmatprep.mubr.bf16.mxu1 %v3877_v44  ;;  %v4269_v44 = vld [vmem:[%s4421_s5] ss:$0 sm:$0xff] }
 0x484   :  { %2413 = vmatmul.mubr.bf16.gmra.mrb[148].mxu1 %v3878_v45  ;;  %v3941_v45 = vld [vmem:[#allocation3 + $0x36c] ss:$16 sps:$4 sm:$0xff]  }
 0x485   :  { %2420 = vmatprep.mubr.bf16.mxu1 %v3879_v46 }
 0x48c   :  { %2421 = vmatmul.mubr.bf16.gmra.mrb[152].mxu1 %v3880_v47  ;;  %v4274_v47 = vstv %s4416_s0  ;;  %s4053_s0 = smov [#allocation9]  }
 0x48d   :  { %2428 = vmatprep.mubr.bf16.mxu1 %v3881_v48  ;;  %s2877_s5 = sshll.u32 %s4053_s0, 4  ;;  %s2878_s5 = int_to_ptr.vmem [resolvable:$true] %s2877_s5 }
 0x48e   :  { %s4017_s15 = scalar_lea.vmem %s2878_s5, 8192  ;;  %p4022_p11 = scmp.lt.s32.totalorder %s2878_s5, %s2878_s5 }
 0x48f   :  { %p4018_p10 = scmp.ne.s32.totalorder %s2878_s5, %s4017_s15  ;;  %p4023_p12 = scmp.lt.s32.totalorder %s4017_s15, %s4017_s15 }
 0x491   :  { %p4024_p13 = por %p4023_p12, %p4022_p11 }
 0x493   :  { %p4025_p0 = pnand %p4024_p13, %p4018_p10 }
 0x494   :  { %2429 = vmatmul.mubr.bf16.gmra.mrb[156].mxu1 %v3882_v49 }
 0x495   :  { %2436 = vmatprep.mubr.bf16.mxu1 %v3883_v50 }
 0x49c   :  { %2437 = vmatmul.mubr.bf16.gmra.mrb[160].mxu1 %v3884_v51 }
 0x49d   :  { %2444 = vmatprep.mubr.bf16.mxu1 %v3885_v52 }
 0x4a4   :  { %2445 = vmatmul.mubr.bf16.gmra.mrb[164].mxu1 %v3886_v53 }
 0x4a5   :  { %2485 = vmatprep.mubr.bf16.mxu1 %v3887_v54 }
 0x4ac   :  { %2486 = vmatmul.mubr.bf16.vlgmr.msra.gmra.mrb[40].mxu1 %v3888_v55  ;;  %v3942_v55 = vld [vmem:[#allocation3 + $0x368] ss:$16 sps:$4 sm:$0xff]  }
 0x4ad   :  { %2493 = vmatprep.mubr.bf16.mxu1 %v3889_v56  ;;  %v3943_v56 = vld [vmem:[#allocation3 + $0x38c] ss:$16 sps:$4 sm:$0xff]  }
 0x4b4   :  { %2494 = vmatmul.mubr.bf16.gmra.mrb[44].mxu1 %v3890_v57 }
 0x4b5   :  { %2501 = vmatprep.mubr.bf16.mxu1 %v3891_v58 }
 0x4bc   :  { %2502 = vmatmul.mubr.bf16.gmra.mrb[48].mxu1 %v3892_v59 }
 0x4bd   :  { %2509 = vmatprep.mubr.bf16.mxu1 %v3893_v60 }
 0x4c4   :  { %2510 = vmatmul.mubr.bf16.gmra.mrb[52].mxu1 %v3894_v61 }
 0x4c5   :  { %2517 = vmatprep.mubr.bf16.mxu1 %v3895_v62 }
 0x4cc   :  { %2518 = vmatmul.mubr.bf16.gmra.mrb[56].mxu1 %v3896_v63 }
 0x4cd   :  { %2525 = vmatprep.mubr.bf16.mxu1 %v3897_v1 }
 0x4d4   :  { %2526 = vmatmul.mubr.bf16.gmra.mrb[60].mxu1 %v3898_v2  ;;  %v3944_v2 = vld [vmem:[#allocation3 + $0x388] ss:$16 sps:$4 sm:$0xff]  }
 0x4d5   :  { %2533 = vmatprep.mubr.bf16.mxu1 %v3899_v3  ;;  %v3945_v3 = vld [vmem:[#allocation3 + $0x3ac] ss:$16 sps:$4 sm:$0xff]  }
 0x4dc   :  { %2534 = vmatmul.mubr.bf16.gmra.mrb[64].mxu1 %v3900_v4 }
 0x4dd   :  { %2541 = vmatprep.mubr.bf16.mxu1 %v3901_v5 }
 0x4e4   :  { %2542 = vmatmul.mubr.bf16.gmra.mrb[68].mxu1 %v3902_v6 }
 0x4e5   :  { %2549 = vmatprep.mubr.bf16.mxu1 %v3903_v7 }
 0x4ec   :  { %2550 = vmatmul.mubr.bf16.gmra.mrb[72].mxu1 %v3904_v8 }
 0x4ed   :  { %2557 = vmatprep.mubr.bf16.mxu1 %v3905_v9 }
 0x4f4   :  { %2558 = vmatmul.mubr.bf16.gmra.mrb[76].mxu1 %v3906_v10 }
 0x4f5   :  { %2565 = vmatprep.mubr.bf16.mxu1 %v3907_v11 }
 0x4fc   :  { %2566 = vmatmul.mubr.bf16.gmra.mrb[80].mxu1 %v3908_v12  ;;  %v3946_v12 = vld [vmem:[#allocation3 + $0x3a8] ss:$16 sps:$4 sm:$0xff]  }
 0x4fd   :  { %2573 = vmatprep.mubr.bf16.mxu1 %v3909_v13  ;;  %v3947_v13 = vld [vmem:[#allocation3 + $0x3cc] ss:$16 sps:$4 sm:$0xff]  }
 0x504   :  { %2574 = vmatmul.mubr.bf16.gmra.mrb[84].mxu1 %v3910_v14 }
 0x505   :  { %2581 = vmatprep.mubr.bf16.mxu1 %v3911_v15 }
 0x50c   :  { %2582 = vmatmul.mubr.bf16.gmra.mrb[88].mxu1 %v3912_v16 }
 0x50d   :  { %2589 = vmatprep.mubr.bf16.mxu1 %v3913_v17 }
 0x514   :  { %2590 = vmatmul.mubr.bf16.gmra.mrb[92].mxu1 %v3914_v18 }
 0x515   :  { %2597 = vmatprep.mubr.bf16.mxu1 %v3915_v19 }
 0x51c   :  { %2598 = vmatmul.mubr.bf16.gmra.mrb[96].mxu1 %v3916_v20 }
 0x51d   :  { %2605 = vmatprep.mubr.bf16.mxu1 %v3917_v21 }
 0x524   :  { %2606 = vmatmul.mubr.bf16.gmra.mrb[100].mxu1 %v3918_v22  ;;  %v3948_v22 = vld [vmem:[#allocation3 + $0x3c8] ss:$16 sps:$4 sm:$0xff]  }
 0x525   :  { %2613 = vmatprep.mubr.bf16.mxu1 %v3919_v23  ;;  %v3949_v23 = vld [vmem:[#allocation3 + $0x3ec] ss:$16 sps:$4 sm:$0xff]  }
 0x52c   :  { %2614 = vmatmul.mubr.bf16.gmra.mrb[104].mxu1 %v3920_v24 }
 0x52d   :  { %2621 = vmatprep.mubr.bf16.mxu1 %v3921_v25 }
 0x534   :  { %2622 = vmatmul.mubr.bf16.gmra.mrb[108].mxu1 %v3922_v26 }
 0x535   :  { %2629 = vmatprep.mubr.bf16.mxu1 %v3923_v27 }
 0x53c   :  { %2630 = vmatmul.mubr.bf16.gmra.mrb[112].mxu1 %v3924_v28 }
 0x53d   :  { %2637 = vmatprep.mubr.bf16.mxu1 %v3925_v29 }
 0x544   :  { %2638 = vmatmul.mubr.bf16.gmra.mrb[116].mxu1 %v3926_v30 }
 0x545   :  { %2645 = vmatprep.mubr.bf16.mxu1 %v3927_v34 }
 0x54c   :  { %2646 = vmatmul.mubr.bf16.gmra.mrb[120].mxu1 %v3928_v31  ;;  %v3950_v31 = vld [vmem:[#allocation3 + $0x3e8] ss:$16 sps:$4 sm:$0xff]  }
 0x54d   :  { %2653 = vmatprep.mubr.bf16.mxu1 %v3929_v0 }
 0x554   :  { %2654 = vmatmul.mubr.bf16.gmra.mrb[124].mxu1 %v3930_v32 }
 0x555   :  { %2661 = vmatprep.mubr.bf16.mxu1 %v3931_v33 }
 0x55c   :  { %2662 = vmatmul.mubr.bf16.gmra.mrb[128].mxu1 %v3932_v35 }
 0x55d   :  { %2669 = vmatprep.mubr.bf16.mxu1 %v3933_v36 }
 0x564   :  { %2670 = vmatmul.mubr.bf16.gmra.mrb[132].mxu1 %v3934_v37 }
 0x565   :  { %2677 = vmatprep.mubr.bf16.mxu1 %v3935_v38 }
 0x56c   :  { %2678 = vmatmul.mubr.bf16.gmra.mrb[136].mxu1 %v3936_v39 }
 0x56d   :  { %2685 = vmatprep.mubr.bf16.mxu1 %v3937_v40 }
 0x574   :  { %2686 = vmatmul.mubr.bf16.gmra.mrb[140].mxu1 %v3938_v41 }
 0x575   :  { %2693 = vmatprep.mubr.bf16.mxu1 %v3939_v42 }
 0x57c   :  { %2694 = vmatmul.mubr.bf16.gmra.mrb[144].mxu1 %v3940_v43 }
 0x57d   :  { %2701 = vmatprep.mubr.bf16.mxu1 %v3941_v45 }
 0x57f   :  { %v2487_v46 = vpop.f32.mrb[40].mxu1 }
 0x580   :  { %v3260_v48 = vadd.f32 %v4269_v44, %v2487_v46  ;;  %v2489_v49 = vpop.f32.mrb[41].mxu1 }
 0x581   :  { %v2490_v50 = vpop.f32.mrb[42].mxu1 }
 0x582   :  { %v2744_v51 = vmul.f32 %v3260_v48, %v4274_v47  ;;  %v3261_v52 = vadd.f32 %v4269_v44, %v2490_v50  ;;  %v2492_v53 = vpop.f32.mrb[43].mxu1 }
 0x584   :  { %2808 = vst [vmem:[#allocation9] sm:$0xff] %v2744_v51  ;;  %v2745_v54 = vmul.f32 %v3261_v52, %v4274_v47  ;;  %2702 = vmatmul.mubr.bf16.gmra.mrb[148].mxu1 %v3942_v55 }
 0x585   :  { %2709 = vmatprep.mubr.bf16.mxu1 %v3943_v56 }
 0x586   :  { %2809 = vst [vmem:[#allocation9 + $0x8] sm:$0xff] %v2745_v54 }
 0x587   :  { %v2495_v57 = vpop.f32.mrb[44].mxu1 }
 0x588   :  { %v3262_v58 = vadd.f32 %v4269_v44, %v2495_v57  ;;  %v2497_v59 = vpop.f32.mrb[45].mxu1 }
 0x589   :  { %v2498_v60 = vpop.f32.mrb[46].mxu1 }
 0x58a   :  { %v2746_v61 = vmul.f32 %v3262_v58, %v4274_v47  ;;  %v3263_v62 = vadd.f32 %v4269_v44, %v2498_v60  ;;  %v2500_v63 = vpop.f32.mrb[47].mxu1 }
 0x58c   :  { %2810 = vst [vmem:[#allocation9 + $0x10] sm:$0xff] %v2746_v61  ;;  %v2747_v1 = vmul.f32 %v3263_v62, %v4274_v47  ;;  %2710 = vmatmul.mubr.bf16.gmra.mrb[152].mxu1 %v3944_v2 }
 0x58d   :  { %2717 = vmatprep.mubr.bf16.mxu1 %v3945_v3 }
 0x58e   :  { %2811 = vst [vmem:[#allocation9 + $0x18] sm:$0xff] %v2747_v1 }
 0x58f   :  { %v2503_v4 = vpop.f32.mrb[48].mxu1 }
 0x590   :  { %v3264_v5 = vadd.f32 %v4269_v44, %v2503_v4  ;;  %v2505_v6 = vpop.f32.mrb[49].mxu1 }
 0x591   :  { %v2506_v7 = vpop.f32.mrb[50].mxu1 }
 0x592   :  { %v2748_v8 = vmul.f32 %v3264_v5, %v4274_v47  ;;  %v3265_v9 = vadd.f32 %v4269_v44, %v2506_v7  ;;  %v2508_v10 = vpop.f32.mrb[51].mxu1 }
 0x594   :  { %2812 = vst [vmem:[#allocation9 + $0x20] sm:$0xff] %v2748_v8  ;;  %v2749_v11 = vmul.f32 %v3265_v9, %v4274_v47  ;;  %2718 = vmatmul.mubr.bf16.gmra.mrb[156].mxu1 %v3946_v12 }
 0x595   :  { %2725 = vmatprep.mubr.bf16.mxu1 %v3947_v13 }
 0x596   :  { %2813 = vst [vmem:[#allocation9 + $0x28] sm:$0xff] %v2749_v11 }
 0x597   :  { %v2511_v14 = vpop.f32.mrb[52].mxu1 }
 0x598   :  { %v3266_v15 = vadd.f32 %v4269_v44, %v2511_v14  ;;  %v2513_v16 = vpop.f32.mrb[53].mxu1 }
 0x599   :  { %v2514_v17 = vpop.f32.mrb[54].mxu1 }
 0x59a   :  { %v2750_v18 = vmul.f32 %v3266_v15, %v4274_v47  ;;  %v3267_v19 = vadd.f32 %v4269_v44, %v2514_v17  ;;  %v2516_v20 = vpop.f32.mrb[55].mxu1 }
 0x59c   :  { %2814 = vst [vmem:[#allocation9 + $0x30] sm:$0xff] %v2750_v18  ;;  %v2751_v21 = vmul.f32 %v3267_v19, %v4274_v47  ;;  %2726 = vmatmul.mubr.bf16.gmra.mrb[160].mxu1 %v3948_v22 }
 0x59d   :  { %2733 = vmatprep.mubr.bf16.mxu1 %v3949_v23 }
 0x59e   :  { %2815 = vst [vmem:[#allocation9 + $0x38] sm:$0xff] %v2751_v21 }
 0x59f   :  { %v2519_v24 = vpop.f32.mrb[56].mxu1 }
 0x5a0   :  { %v3268_v25 = vadd.f32 %v4269_v44, %v2519_v24  ;;  %v2521_v26 = vpop.f32.mrb[57].mxu1 }
 0x5a1   :  { %v2522_v27 = vpop.f32.mrb[58].mxu1 }
 0x5a2   :  { %v2752_v28 = vmul.f32 %v3268_v25, %v4274_v47  ;;  %v3269_v29 = vadd.f32 %v4269_v44, %v2522_v27  ;;  %v2524_v30 = vpop.f32.mrb[59].mxu1 }
 0x5a4   :  { %2816 = vst [vmem:[#allocation9 + $0x40] sm:$0xff] %v2752_v28  ;;  %v2753_v34 = vmul.f32 %v3269_v29, %v4274_v47  ;;  %2734 = vmatmul.mubr.bf16.gmra.mrb[164].mxu1 %v3950_v31 }
 0x5a6   :  { %2817 = vst [vmem:[#allocation9 + $0x48] sm:$0xff] %v2753_v34 }
 0x5a7   :  { %v2527_v0 = vpop.f32.mrb[60].mxu1 }
 0x5a8   :  { %v3270_v32 = vadd.f32 %v4269_v44, %v2527_v0  ;;  %v2529_v33 = vpop.f32.mrb[61].mxu1 }
 0x5a9   :  { %v2530_v35 = vpop.f32.mrb[62].mxu1 }
 0x5aa   :  { %v2754_v36 = vmul.f32 %v3270_v32, %v4274_v47  ;;  %v3271_v37 = vadd.f32 %v4269_v44, %v2530_v35  ;;  %v2532_v38 = vpop.f32.mrb[63].mxu1 }
 0x5ac   :  { %2818 = vst [vmem:[#allocation9 + $0x50] sm:$0xff] %v2754_v36  ;;  %v2755_v39 = vmul.f32 %v3271_v37, %v4274_v47 }
 0x5ae   :  { %2819 = vst [vmem:[#allocation9 + $0x58] sm:$0xff] %v2755_v39 }
 0x5af   :  { %v2535_v40 = vpop.f32.mrb[64].mxu1 }
 0x5b0   :  { %v3272_v41 = vadd.f32 %v4269_v44, %v2535_v40  ;;  %v2537_v42 = vpop.f32.mrb[65].mxu1 }
 0x5b1   :  { %v2538_v43 = vpop.f32.mrb[66].mxu1 }
 0x5b2   :  { %v2756_v45 = vmul.f32 %v3272_v41, %v4274_v47  ;;  %v3273_v46 = vadd.f32 %v4269_v44, %v2538_v43  ;;  %v2540_v48 = vpop.f32.mrb[67].mxu1 }
 0x5b4   :  { %2820 = vst [vmem:[#allocation9 + $0x60] sm:$0xff] %v2756_v45  ;;  %v2757_v49 = vmul.f32 %v3273_v46, %v4274_v47 }
 0x5b6   :  { %2821 = vst [vmem:[#allocation9 + $0x68] sm:$0xff] %v2757_v49 }
 0x5b7   :  { %v2543_v50 = vpop.f32.mrb[68].mxu1 }
 0x5b8   :  { %v3274_v51 = vadd.f32 %v4269_v44, %v2543_v50  ;;  %v2545_v52 = vpop.f32.mrb[69].mxu1 }
 0x5b9   :  { %v2546_v53 = vpop.f32.mrb[70].mxu1 }
 0x5ba   :  { %v2758_v54 = vmul.f32 %v3274_v51, %v4274_v47  ;;  %v3275_v55 = vadd.f32 %v4269_v44, %v2546_v53  ;;  %v2548_v56 = vpop.f32.mrb[71].mxu1 }
 0x5bc   :  { %2822 = vst [vmem:[#allocation9 + $0x70] sm:$0xff] %v2758_v54  ;;  %v2759_v57 = vmul.f32 %v3275_v55, %v4274_v47 }
 0x5be   :  { %2823 = vst [vmem:[#allocation9 + $0x78] sm:$0xff] %v2759_v57 }
 0x5bf   :  { %v2551_v58 = vpop.f32.mrb[72].mxu1 }
 0x5c0   :  { %v3276_v59 = vadd.f32 %v4269_v44, %v2551_v58  ;;  %v2553_v60 = vpop.f32.mrb[73].mxu1 }
 0x5c1   :  { %v2554_v61 = vpop.f32.mrb[74].mxu1 }
 0x5c2   :  { %v2760_v62 = vmul.f32 %v3276_v59, %v4274_v47  ;;  %v3277_v63 = vadd.f32 %v4269_v44, %v2554_v61  ;;  %v2556_v1 = vpop.f32.mrb[75].mxu1 }
 0x5c4   :  { %2824 = vst [vmem:[#allocation9 + $0x80] sm:$0xff] %v2760_v62  ;;  %v2761_v2 = vmul.f32 %v3277_v63, %v4274_v47 }
 0x5c6   :  { %2825 = vst [vmem:[#allocation9 + $0x88] sm:$0xff] %v2761_v2 }
 0x5c7   :  { %v2559_v3 = vpop.f32.mrb[76].mxu1 }
 0x5c8   :  { %v3278_v4 = vadd.f32 %v4269_v44, %v2559_v3  ;;  %v2561_v5 = vpop.f32.mrb[77].mxu1 }
 0x5c9   :  { %v2562_v6 = vpop.f32.mrb[78].mxu1 }
 0x5ca   :  { %v2762_v7 = vmul.f32 %v3278_v4, %v4274_v47  ;;  %v3279_v8 = vadd.f32 %v4269_v44, %v2562_v6  ;;  %v2564_v9 = vpop.f32.mrb[79].mxu1 }
 0x5cc   :  { %2826 = vst [vmem:[#allocation9 + $0x90] sm:$0xff] %v2762_v7  ;;  %v2763_v10 = vmul.f32 %v3279_v8, %v4274_v47 }
 0x5ce   :  { %2827 = vst [vmem:[#allocation9 + $0x98] sm:$0xff] %v2763_v10 }
 0x5cf   :  { %v2567_v11 = vpop.f32.mrb[80].mxu1 }
 0x5d0   :  { %v3280_v12 = vadd.f32 %v4269_v44, %v2567_v11  ;;  %v2569_v13 = vpop.f32.mrb[81].mxu1 }
 0x5d1   :  { %v2570_v14 = vpop.f32.mrb[82].mxu1 }
 0x5d2   :  { %v2764_v15 = vmul.f32 %v3280_v12, %v4274_v47  ;;  %v3281_v16 = vadd.f32 %v4269_v44, %v2570_v14  ;;  %v2572_v17 = vpop.f32.mrb[83].mxu1 }
 0x5d4   :  { %2828 = vst [vmem:[#allocation9 + $0xa0] sm:$0xff] %v2764_v15  ;;  %v2765_v18 = vmul.f32 %v3281_v16, %v4274_v47 }
 0x5d6   :  { %2829 = vst [vmem:[#allocation9 + $0xa8] sm:$0xff] %v2765_v18 }
 0x5d7   :  { %v2575_v19 = vpop.f32.mrb[84].mxu1 }
 0x5d8   :  { %v3282_v20 = vadd.f32 %v4269_v44, %v2575_v19  ;;  %v2577_v21 = vpop.f32.mrb[85].mxu1 }
 0x5d9   :  { %v2578_v22 = vpop.f32.mrb[86].mxu1 }
 0x5da   :  { %v2766_v23 = vmul.f32 %v3282_v20, %v4274_v47  ;;  %v3283_v24 = vadd.f32 %v4269_v44, %v2578_v22  ;;  %v2580_v25 = vpop.f32.mrb[87].mxu1 }
 0x5dc   :  { %2830 = vst [vmem:[#allocation9 + $0xb0] sm:$0xff] %v2766_v23  ;;  %v2767_v26 = vmul.f32 %v3283_v24, %v4274_v47 }
 0x5de   :  { %2831 = vst [vmem:[#allocation9 + $0xb8] sm:$0xff] %v2767_v26 }
 0x5df   :  { %v2583_v27 = vpop.f32.mrb[88].mxu1 }
 0x5e0   :  { %v3284_v28 = vadd.f32 %v4269_v44, %v2583_v27  ;;  %v2585_v29 = vpop.f32.mrb[89].mxu1 }
 0x5e1   :  { %v2586_v30 = vpop.f32.mrb[90].mxu1 }
 0x5e2   :  { %v2768_v34 = vmul.f32 %v3284_v28, %v4274_v47  ;;  %v3285_v31 = vadd.f32 %v4269_v44, %v2586_v30  ;;  %v2588_v0 = vpop.f32.mrb[91].mxu1 }
 0x5e4   :  { %2832 = vst [vmem:[#allocation9 + $0xc0] sm:$0xff] %v2768_v34  ;;  %v2769_v32 = vmul.f32 %v3285_v31, %v4274_v47 }
 0x5e6   :  { %2833 = vst [vmem:[#allocation9 + $0xc8] sm:$0xff] %v2769_v32 }
 0x5e7   :  { %v2591_v33 = vpop.f32.mrb[92].mxu1 }
 0x5e8   :  { %v3286_v35 = vadd.f32 %v4269_v44, %v2591_v33  ;;  %v2593_v36 = vpop.f32.mrb[93].mxu1 }
 0x5e9   :  { %v2594_v37 = vpop.f32.mrb[94].mxu1 }
 0x5ea   :  { %v2770_v38 = vmul.f32 %v3286_v35, %v4274_v47  ;;  %v3287_v39 = vadd.f32 %v4269_v44, %v2594_v37  ;;  %v2596_v40 = vpop.f32.mrb[95].mxu1 }
 0x5ec   :  { %2834 = vst [vmem:[#allocation9 + $0xd0] sm:$0xff] %v2770_v38  ;;  %v2771_v41 = vmul.f32 %v3287_v39, %v4274_v47 }
 0x5ee   :  { %2835 = vst [vmem:[#allocation9 + $0xd8] sm:$0xff] %v2771_v41 }
 0x5ef   :  { %v2599_v42 = vpop.f32.mrb[96].mxu1 }
 0x5f0   :  { %v3288_v43 = vadd.f32 %v4269_v44, %v2599_v42  ;;  %v2601_v45 = vpop.f32.mrb[97].mxu1 }
 0x5f1   :  { %v2602_v46 = vpop.f32.mrb[98].mxu1 }
 0x5f2   :  { %v2772_v48 = vmul.f32 %v3288_v43, %v4274_v47  ;;  %v3289_v49 = vadd.f32 %v4269_v44, %v2602_v46  ;;  %v2604_v50 = vpop.f32.mrb[99].mxu1 }
 0x5f4   :  { %2836 = vst [vmem:[#allocation9 + $0xe0] sm:$0xff] %v2772_v48  ;;  %v2773_v51 = vmul.f32 %v3289_v49, %v4274_v47 }
 0x5f6   :  { %2837 = vst [vmem:[#allocation9 + $0xe8] sm:$0xff] %v2773_v51 }
 0x5f7   :  { %v2607_v52 = vpop.f32.mrb[100].mxu1 }
 0x5f8   :  { %v3290_v53 = vadd.f32 %v4269_v44, %v2607_v52  ;;  %v2609_v54 = vpop.f32.mrb[101].mxu1 }
 0x5f9   :  { %v2610_v55 = vpop.f32.mrb[102].mxu1 }
 0x5fa   :  { %v2774_v56 = vmul.f32 %v3290_v53, %v4274_v47  ;;  %v3291_v57 = vadd.f32 %v4269_v44, %v2610_v55  ;;  %v2612_v58 = vpop.f32.mrb[103].mxu1 }
 0x5fc   :  { %2838 = vst [vmem:[#allocation9 + $0xf0] sm:$0xff] %v2774_v56  ;;  %v2775_v59 = vmul.f32 %v3291_v57, %v4274_v47 }
 0x5fe   :  { %2839 = vst [vmem:[#allocation9 + $0xf8] sm:$0xff] %v2775_v59 }
 0x5ff   :  { %v2615_v60 = vpop.f32.mrb[104].mxu1 }
 0x600   :  { %v3292_v61 = vadd.f32 %v4269_v44, %v2615_v60  ;;  %v2617_v62 = vpop.f32.mrb[105].mxu1 }
 0x601   :  { %v2618_v63 = vpop.f32.mrb[106].mxu1 }
 0x602   :  { %v2776_v1 = vmul.f32 %v3292_v61, %v4274_v47  ;;  %v3293_v2 = vadd.f32 %v4269_v44, %v2618_v63  ;;  %v2620_v3 = vpop.f32.mrb[107].mxu1 }
 0x604   :  { %2840 = vst [vmem:[#allocation9 + $0x100] sm:$0xff] %v2776_v1  ;;  %v2777_v4 = vmul.f32 %v3293_v2, %v4274_v47 }
 0x606   :  { %2841 = vst [vmem:[#allocation9 + $0x108] sm:$0xff] %v2777_v4 }
 0x607   :  { %v2623_v5 = vpop.f32.mrb[108].mxu1 }
 0x608   :  { %v3294_v6 = vadd.f32 %v4269_v44, %v2623_v5  ;;  %v2625_v7 = vpop.f32.mrb[109].mxu1 }
 0x609   :  { %v2626_v8 = vpop.f32.mrb[110].mxu1 }
 0x60a   :  { %v2778_v9 = vmul.f32 %v3294_v6, %v4274_v47  ;;  %v3295_v10 = vadd.f32 %v4269_v44, %v2626_v8  ;;  %v2628_v11 = vpop.f32.mrb[111].mxu1 }
 0x60c   :  { %2842 = vst [vmem:[#allocation9 + $0x110] sm:$0xff] %v2778_v9  ;;  %v2779_v12 = vmul.f32 %v3295_v10, %v4274_v47 }
 0x60e   :  { %2843 = vst [vmem:[#allocation9 + $0x118] sm:$0xff] %v2779_v12 }
 0x60f   :  { %v2631_v13 = vpop.f32.mrb[112].mxu1 }
 0x610   :  { %v3296_v14 = vadd.f32 %v4269_v44, %v2631_v13  ;;  %v2633_v15 = vpop.f32.mrb[113].mxu1 }
 0x611   :  { %v2634_v16 = vpop.f32.mrb[114].mxu1 }
 0x612   :  { %v2780_v17 = vmul.f32 %v3296_v14, %v4274_v47  ;;  %v3297_v18 = vadd.f32 %v4269_v44, %v2634_v16  ;;  %v2636_v19 = vpop.f32.mrb[115].mxu1 }
 0x614   :  { %2844 = vst [vmem:[#allocation9 + $0x120] sm:$0xff] %v2780_v17  ;;  %v2781_v20 = vmul.f32 %v3297_v18, %v4274_v47 }
 0x616   :  { %2845 = vst [vmem:[#allocation9 + $0x128] sm:$0xff] %v2781_v20 }
 0x617   :  { %v2639_v21 = vpop.f32.mrb[116].mxu1 }
 0x618   :  { %v3298_v22 = vadd.f32 %v4269_v44, %v2639_v21  ;;  %v2641_v23 = vpop.f32.mrb[117].mxu1 }
 0x619   :  { %v2642_v24 = vpop.f32.mrb[118].mxu1 }
 0x61a   :  { %v2782_v25 = vmul.f32 %v3298_v22, %v4274_v47  ;;  %v3299_v26 = vadd.f32 %v4269_v44, %v2642_v24  ;;  %v2644_v27 = vpop.f32.mrb[119].mxu1 }
 0x61c   :  { %2846 = vst [vmem:[#allocation9 + $0x130] sm:$0xff] %v2782_v25  ;;  %v2783_v28 = vmul.f32 %v3299_v26, %v4274_v47 }
 0x61e   :  { %2847 = vst [vmem:[#allocation9 + $0x138] sm:$0xff] %v2783_v28 }
 0x61f   :  { %v2647_v29 = vpop.f32.mrb[120].mxu1 }
 0x620   :  { %v3300_v30 = vadd.f32 %v4269_v44, %v2647_v29  ;;  %v2649_v34 = vpop.f32.mrb[121].mxu1 }
 0x621   :  { %v2650_v31 = vpop.f32.mrb[122].mxu1 }
 0x622   :  { %v2784_v0 = vmul.f32 %v3300_v30, %v4274_v47  ;;  %v3301_v32 = vadd.f32 %v4269_v44, %v2650_v31  ;;  %v2652_v33 = vpop.f32.mrb[123].mxu1 }
 0x624   :  { %2848 = vst [vmem:[#allocation9 + $0x140] sm:$0xff] %v2784_v0  ;;  %v2785_v35 = vmul.f32 %v3301_v32, %v4274_v47 }
 0x626   :  { %2849 = vst [vmem:[#allocation9 + $0x148] sm:$0xff] %v2785_v35 }
 0x627   :  { %v2655_v36 = vpop.f32.mrb[124].mxu1 }
 0x628   :  { %v3302_v37 = vadd.f32 %v4269_v44, %v2655_v36  ;;  %v2657_v38 = vpop.f32.mrb[125].mxu1 }
 0x629   :  { %v2658_v39 = vpop.f32.mrb[126].mxu1 }
 0x62a   :  { %v2786_v40 = vmul.f32 %v3302_v37, %v4274_v47  ;;  %v3303_v41 = vadd.f32 %v4269_v44, %v2658_v39  ;;  %v2660_v42 = vpop.f32.mrb[127].mxu1 }
 0x62c   :  { %2850 = vst [vmem:[#allocation9 + $0x150] sm:$0xff] %v2786_v40  ;;  %v2787_v43 = vmul.f32 %v3303_v41, %v4274_v47 }
 0x62e   :  { %2851 = vst [vmem:[#allocation9 + $0x158] sm:$0xff] %v2787_v43 }
 0x62f   :  { %v2663_v45 = vpop.f32.mrb[128].mxu1 }
 0x630   :  { %v3304_v46 = vadd.f32 %v4269_v44, %v2663_v45  ;;  %v2665_v48 = vpop.f32.mrb[129].mxu1 }
 0x631   :  { %v2666_v49 = vpop.f32.mrb[130].mxu1 }
 0x632   :  { %v2788_v50 = vmul.f32 %v3304_v46, %v4274_v47  ;;  %v3305_v51 = vadd.f32 %v4269_v44, %v2666_v49  ;;  %v2668_v52 = vpop.f32.mrb[131].mxu1 }
 0x634   :  { %2852 = vst [vmem:[#allocation9 + $0x160] sm:$0xff] %v2788_v50  ;;  %v2789_v53 = vmul.f32 %v3305_v51, %v4274_v47 }
 0x636   :  { %2853 = vst [vmem:[#allocation9 + $0x168] sm:$0xff] %v2789_v53 }
 0x637   :  { %v2671_v54 = vpop.f32.mrb[132].mxu1 }
 0x638   :  { %v3306_v55 = vadd.f32 %v4269_v44, %v2671_v54  ;;  %v2673_v56 = vpop.f32.mrb[133].mxu1 }
 0x639   :  { %v2674_v57 = vpop.f32.mrb[134].mxu1 }
 0x63a   :  { %v2790_v58 = vmul.f32 %v3306_v55, %v4274_v47  ;;  %v3307_v59 = vadd.f32 %v4269_v44, %v2674_v57  ;;  %v2676_v60 = vpop.f32.mrb[135].mxu1 }
 0x63c   :  { %2854 = vst [vmem:[#allocation9 + $0x170] sm:$0xff] %v2790_v58  ;;  %v2791_v61 = vmul.f32 %v3307_v59, %v4274_v47 }
 0x63e   :  { %2855 = vst [vmem:[#allocation9 + $0x178] sm:$0xff] %v2791_v61 }
 0x63f   :  { %v2679_v62 = vpop.f32.mrb[136].mxu1 }
 0x640   :  { %v3308_v63 = vadd.f32 %v4269_v44, %v2679_v62  ;;  %v2681_v1 = vpop.f32.mrb[137].mxu1 }
 0x641   :  { %v2682_v2 = vpop.f32.mrb[138].mxu1 }
 0x642   :  { %v2792_v3 = vmul.f32 %v3308_v63, %v4274_v47  ;;  %v3309_v4 = vadd.f32 %v4269_v44, %v2682_v2  ;;  %v2684_v5 = vpop.f32.mrb[139].mxu1 }
 0x644   :  { %2856 = vst [vmem:[#allocation9 + $0x180] sm:$0xff] %v2792_v3  ;;  %v2793_v6 = vmul.f32 %v3309_v4, %v4274_v47 }
 0x646   :  { %2857 = vst [vmem:[#allocation9 + $0x188] sm:$0xff] %v2793_v6 }
 0x647   :  { %v2687_v7 = vpop.f32.mrb[140].mxu1 }
 0x648   :  { %v3310_v8 = vadd.f32 %v4269_v44, %v2687_v7  ;;  %v2689_v9 = vpop.f32.mrb[141].mxu1 }
 0x649   :  { %v2690_v10 = vpop.f32.mrb[142].mxu1 }
 0x64a   :  { %v2794_v11 = vmul.f32 %v3310_v8, %v4274_v47  ;;  %v3311_v12 = vadd.f32 %v4269_v44, %v2690_v10  ;;  %v2692_v13 = vpop.f32.mrb[143].mxu1 }
 0x64c   :  { %2858 = vst [vmem:[#allocation9 + $0x190] sm:$0xff] %v2794_v11  ;;  %v2795_v14 = vmul.f32 %v3311_v12, %v4274_v47 }
 0x64e   :  { %2859 = vst [vmem:[#allocation9 + $0x198] sm:$0xff] %v2795_v14 }
 0x64f   :  { %v2695_v15 = vpop.f32.mrb[144].mxu1 }
 0x650   :  { %v3312_v16 = vadd.f32 %v4269_v44, %v2695_v15  ;;  %v2697_v17 = vpop.f32.mrb[145].mxu1 }
 0x651   :  { %v2698_v18 = vpop.f32.mrb[146].mxu1 }
 0x652   :  { %v2796_v19 = vmul.f32 %v3312_v16, %v4274_v47  ;;  %v3313_v20 = vadd.f32 %v4269_v44, %v2698_v18  ;;  %v2700_v21 = vpop.f32.mrb[147].mxu1 }
 0x654   :  { %2860 = vst [vmem:[#allocation9 + $0x1a0] sm:$0xff] %v2796_v19  ;;  %v2797_v22 = vmul.f32 %v3313_v20, %v4274_v47 }
 0x656   :  { %2861 = vst [vmem:[#allocation9 + $0x1a8] sm:$0xff] %v2797_v22 }
 0x657   :  { %v2703_v23 = vpop.f32.mrb[148].mxu1 }
 0x658   :  { %v3314_v24 = vadd.f32 %v4269_v44, %v2703_v23  ;;  %v2705_v25 = vpop.f32.mrb[149].mxu1 }
 0x659   :  { %v2706_v26 = vpop.f32.mrb[150].mxu1 }
 0x65a   :  { %v2798_v27 = vmul.f32 %v3314_v24, %v4274_v47  ;;  %v3315_v28 = vadd.f32 %v4269_v44, %v2706_v26  ;;  %v2708_v29 = vpop.f32.mrb[151].mxu1 }
 0x65c   :  { %2862 = vst [vmem:[#allocation9 + $0x1b0] sm:$0xff] %v2798_v27  ;;  %v2799_v30 = vmul.f32 %v3315_v28, %v4274_v47 }
 0x65e   :  { %2863 = vst [vmem:[#allocation9 + $0x1b8] sm:$0xff] %v2799_v30 }
 0x65f   :  { %v2711_v34 = vpop.f32.mrb[152].mxu1 }
 0x660   :  { %v3316_v31 = vadd.f32 %v4269_v44, %v2711_v34  ;;  %v2713_v0 = vpop.f32.mrb[153].mxu1 }
 0x661   :  { %v2714_v32 = vpop.f32.mrb[154].mxu1 }
 0x662   :  { %v2800_v33 = vmul.f32 %v3316_v31, %v4274_v47  ;;  %v3317_v35 = vadd.f32 %v4269_v44, %v2714_v32  ;;  %v2716_v36 = vpop.f32.mrb[155].mxu1 }
 0x664   :  { %2864 = vst [vmem:[#allocation9 + $0x1c0] sm:$0xff] %v2800_v33  ;;  %v2801_v37 = vmul.f32 %v3317_v35, %v4274_v47 }
 0x666   :  { %2865 = vst [vmem:[#allocation9 + $0x1c8] sm:$0xff] %v2801_v37 }
 0x667   :  { %v2719_v38 = vpop.f32.mrb[156].mxu1 }
 0x668   :  { %v3318_v39 = vadd.f32 %v4269_v44, %v2719_v38  ;;  %v2721_v40 = vpop.f32.mrb[157].mxu1 }
 0x669   :  { %v2722_v41 = vpop.f32.mrb[158].mxu1 }
 0x66a   :  { %v2802_v42 = vmul.f32 %v3318_v39, %v4274_v47  ;;  %v3319_v43 = vadd.f32 %v4269_v44, %v2722_v41  ;;  %v2724_v45 = vpop.f32.mrb[159].mxu1 }
 0x66c   :  { %2866 = vst [vmem:[#allocation9 + $0x1d0] sm:$0xff] %v2802_v42  ;;  %v2803_v46 = vmul.f32 %v3319_v43, %v4274_v47 }
 0x66e   :  { %2867 = vst [vmem:[#allocation9 + $0x1d8] sm:$0xff] %v2803_v46 }
 0x66f   :  { %v2727_v48 = vpop.f32.mrb[160].mxu1 }
 0x670   :  { %v3320_v49 = vadd.f32 %v4269_v44, %v2727_v48  ;;  %v2729_v50 = vpop.f32.mrb[161].mxu1 }
 0x671   :  { %v2730_v51 = vpop.f32.mrb[162].mxu1 }
 0x672   :  { %v2804_v52 = vmul.f32 %v3320_v49, %v4274_v47  ;;  %v3321_v53 = vadd.f32 %v4269_v44, %v2730_v51  ;;  %v2732_v54 = vpop.f32.mrb[163].mxu1 }
 0x674   :  { %2868 = vst [vmem:[#allocation9 + $0x1e0] sm:$0xff] %v2804_v52  ;;  %v2805_v55 = vmul.f32 %v3321_v53, %v4274_v47 }
 0x676   :  { %2869 = vst [vmem:[#allocation9 + $0x1e8] sm:$0xff] %v2805_v55 }
 0x677   :  { %v2735_v56 = vpop.f32.mrb[164].mxu1 }
 0x678   :  { %v3322_v57 = vadd.f32 %v4269_v44, %v2735_v56  ;;  %v2737_v58 = vpop.f32.mrb[165].mxu1 }
 0x679   :  { %v2738_v59 = vpop.f32.mrb[166].mxu1 }
 0x67a   :  { %v2806_v60 = vmul.f32 %v3322_v57, %v4274_v47  ;;  %v3323_v61 = vadd.f32 %v4269_v44, %v2738_v59  ;;  %v2740_v62 = vpop.f32.mrb[167].mxu1 }
 0x67c   :  { %2870 = vst [vmem:[#allocation9 + $0x1f0] sm:$0xff] %v2806_v60  ;;  %v2807_v63 = vmul.f32 %v3323_v61, %v4274_v47 }
 0x67e   :  { %2871 = vst [vmem:[#allocation9 + $0x1f8] sm:$0xff] %v2807_v63 }
 0x67f   :  { %4028 = shalt.err (!%p4025_p0)
}
 0x680   :  { %s4029_s18 = scalar_lea.hbm %s4422_s6, 8192 }
 0x681   :  { %p4030_p1 = scmp.ne.s32.totalorder %s4422_s6, %s4029_s18  ;;  %p4033_p2 = scmp.lt.u32.totalorder %s4029_s18, %s4422_s6 }
 0x683   :  { %p4035_p3 = pnand %p4033_p2, %p4030_p1 }
 0x685   :  { %4038 = shalt.err (!%p4035_p3)
}
 0x686   :  { %s4054_s22 = smov 128   ;;  %s4055_s23 = smov 8  }
 0x687   :  { %2883 = dma.vmem_to_hbm [thread:$0]  %s2878_s5, 8192, %s4422_s6, [#allocation5], %s4054_s22, %s4054_s22, %s4055_s23  }
 0x688   :  { %4043 = dma.done.wait [#allocation5], 8192  }
 0x689   :  { %4044 = vsyncadd [#allocation5], 4294959104 }
 0x68a   :  { %2887 = vsyncpa [#allocation4], 1 }
 0x68b   :  { %2888 = vsyncpa [#allocation7], 1 }
 0x68c   :  { %2889 = vsyncpa [#allocation5], 1 }

</bundles_post_ra>
